<compile_context>
chip_gen: v6e
topology: v6e:2x2x1
jax: 0.10.0
libtpu: 0.0.40
codegen_flags: <defaults>
</compile_context>

<pallas_src>
import numpy as np
import jax
import jax.numpy as jnp
from jax import lax
from jax.experimental import pallas as pl
from jax.experimental.pallas import tpu as pltpu  # noqa: F401  (TPU backend)

BN_EPS = 1e-5


# ----------------------------------------------------------------------------
# Fused Pallas kernel.
# Activation layout everywhere: (H, W*N*C) with lane index = x*(N*C) + n*C + c.
# ----------------------------------------------------------------------------
def _hr_module_kernel(
    x0_ref, x1_ref,
    m0a_ref, b0a_ref, m0b_ref, b0b_ref, r0_ref,      # branch 0 (C=4) convs
    m1a_ref, b1a_ref, m1b_ref, b1b_ref, r1_ref,      # branch 1 (C=8) convs
    m01_ref, b01_ref, d01_ref,                       # fuse 0 <- 1 (1x1 conv + up x2)
    m10_ref, b10_ref, r10_ref,                       # fuse 1 <- 0 (3x3 stride-2 conv)
    y0_ref, y1_ref,
):
    def conv_bn(x, m_ref, r_ref, b_ref):
        # x: (Hin, Win*N*Cin); r_ref: (3, Hout, Hin); m_ref: (3, Win*N*Cin, Wout*N*Cout)
        acc = None
        for ky in range(3):
            rows = jnp.dot(r_ref[ky], x, preferred_element_type=jnp.float32)
            term = jnp.dot(rows, m_ref[ky], preferred_element_type=jnp.float32)
            acc = term if acc is None else acc + term
        return acc + b_ref[...]

    x0 = x0_ref[...]
    x1 = x1_ref[...]

    # Branch 0: BasicBlock = conv3x3-BN-ReLU, conv3x3-BN, +identity, ReLU
    t0 = jnp.maximum(conv_bn(x0, m0a_ref, r0_ref, b0a_ref), 0.0)
    b0 = jnp.maximum(conv_bn(t0, m0b_ref, r0_ref, b0b_ref) + x0, 0.0)

    # Branch 1: BasicBlock
    t1 = jnp.maximum(conv_bn(x1, m1a_ref, r1_ref, b1a_ref), 0.0)
    b1 = jnp.maximum(conv_bn(t1, m1b_ref, r1_ref, b1b_ref) + x1, 0.0)

    # Fuse 0 <- 1: 1x1 conv + BN + nearest-2x upsample.  The column upsample is
    # folded into m01; the row upsample is the constant doubling matrix d01.
    z01 = jnp.dot(
        d01_ref[...],
        jnp.dot(b1, m01_ref[...], preferred_element_type=jnp.float32),
        preferred_element_type=jnp.float32,
    ) + b01_ref[...]
    y0_ref[...] = jnp.maximum(b0 + z01, 0.0)

    # Fuse 1 <- 0: 3x3 stride-2 conv + BN (stride folded into r10 / m10).
    z10 = conv_bn(b0, m10_ref, r10_ref, b10_ref)
    y1_ref[...] = jnp.maximum(z10 + b1, 0.0)


# ----------------------------------------------------------------------------
# Host-side constant builders (run once; fold conv taps / padding / stride /
# upsample / BN-scale into small dense matrices).
# ----------------------------------------------------------------------------
def _band_matrix(w_hwio, scale, *, win, wout, stride, n):
    """KxK conv (+BN scale) folded over the lane axis into banded matrices."""
    w = np.asarray(w_hwio, np.float32) * np.asarray(scale, np.float32)[None, None, None, :]
    k = w.shape[0]
    cin, cout = w.shape[2], w.shape[3]
    m = np.zeros((k, win * n * cin, wout * n * cout), np.float32)
    for ky in range(k):
        for xo in range(wout):
            for kx in range(k):
                xi = xo * stride + kx - (k // 2)
                if 0 <= xi < win:
                    for b in range(n):
                        rs = (xi * n + b) * cin
                        cs = (xo * n + b) * cout
                        m[ky, rs:rs + cin, cs:cs + cout] = w[ky, kx]
    return m


def _row_select(hout, hin, stride, k=3):
    r = np.zeros((k, hout, hin), np.float32)
    for ky in range(k):
        for yo in range(hout):
            yi = yo * stride + ky - (k // 2)
            if 0 <= yi < hin:
                r[ky, yo, yi] = 1.0
    return r


def _upsample_1x1_matrix(w_hwio, scale, *, wout, n):
    """1x1 conv (+BN scale) with nearest-2x column upsample folded in."""
    w = np.asarray(w_hwio, np.float32)[0, 0] * np.asarray(scale, np.float32)[None, :]
    cin, cout = w.shape
    win = wout // 2
    m = np.zeros((win * n * cin, wout * n * cout), np.float32)
    for xo in range(wout):
        xi = xo // 2
        for b in range(n):
            rs = (xi * n + b) * cin
            cs = (xo * n + b) * cout
            m[rs:rs + cin, cs:cs + cout] = w
    return m


def _row_double(hout, hin):
    d = np.zeros((hout, hin), np.float32)
    for yo in range(hout):
        d[yo, yo // 2] = 1.0
    return d


def _tile_bias(bias, groups):
    return np.tile(np.asarray(bias, np.float32), groups)[None, :]


# ----------------------------------------------------------------------------
# Layout helpers (boundary glue only: NCHW <-> lane-dense (H, W*N*C)).
# ----------------------------------------------------------------------------
def _nchw_to_rows(x):
    n, c, h, w = x.shape
    return jnp.transpose(x, (2, 3, 0, 1)).reshape(h, w * n * c)


def _rows_to_nhwc(y, n, c):
    h = y.shape[0]
    w = y.shape[1] // (n * c)
    return jnp.transpose(y.reshape(h, w, n, c), (2, 0, 1, 3))


# ----------------------------------------------------------------------------
# Module builder
# ----------------------------------------------------------------------------
def make_hr_module(params, n, h0, w0, c0, h1, w1, c1):
    assert h0 == 2 * h1 and w0 == 2 * w1
    p0, p1 = params["branch0"], params["branch1"]
    f01, f10 = params["fuse01"], params["fuse10"]

    consts = [
        _band_matrix(p0["w1"], p0["s1"], win=w0, wout=w0, stride=1, n=n),
        _tile_bias(p0["b1"], w0 * n),
        _band_matrix(p0["w2"], p0["s2"], win=w0, wout=w0, stride=1, n=n),
        _tile_bias(p0["b2"], w0 * n),
        _row_select(h0, h0, 1),
        _band_matrix(p1["w1"], p1["s1"], win=w1, wout=w1, stride=1, n=n),
        _tile_bias(p1["b1"], w1 * n),
        _band_matrix(p1["w2"], p1["s2"], win=w1, wout=w1, stride=1, n=n),
        _tile_bias(p1["b2"], w1 * n),
        _row_select(h1, h1, 1),
        _upsample_1x1_matrix(f01["w"], f01["s"], wout=w0, n=n),
        _tile_bias(f01["b"], w0 * n),
        _row_double(h0, h1),
        _band_matrix(f10["w"], f10["s"], win=w0, wout=w1, stride=2, n=n),
        _tile_bias(f10["b"], w1 * n),
        _row_select(h1, h0, 2),
    ]
    consts = [jnp.asarray(c) for c in consts]

    fused = pl.pallas_call(
        _hr_module_kernel,
        out_shape=(
            jax.ShapeDtypeStruct((h0, w0 * n * c0), jnp.float32),
            jax.ShapeDtypeStruct((h1, w1 * n * c1), jnp.float32),
        ),
    )

    @jax.jit
    def forward(x0_nchw, x1_nchw):
        y0r, y1r = fused(_nchw_to_rows(x0_nchw), _nchw_to_rows(x1_nchw), *consts)
        return _rows_to_nhwc(y0r, n, c0), _rows_to_nhwc(y1r, n, c1)

    return forward


# ----------------------------------------------------------------------------
# Pure-JAX reference (lax.conv) for verification
# ----------------------------------------------------------------------------
def conv_bn_ref(x, w, s, b, *, stride=1, relu=False, residual=None):
    pad = (w.shape[0] - 1) // 2
    y = lax.conv_general_dilated(
        x, w, (stride, stride), ((pad, pad), (pad, pad)),
        dimension_numbers=("NHWC", "HWIO", "NHWC"))
    y = y * s + b
    if residual is not None:
        y = y + residual
    if relu:
        y = jnp.maximum(y, 0.0)
    return y


def hr_module_forward_ref(params, x0, x1):
    def block_ref(x, p):
        out = conv_bn_ref(x, p["w1"], p["s1"], p["b1"], relu=True)
        return conv_bn_ref(out, p["w2"], p["s2"], p["b2"], relu=True, residual=x)

    x0 = block_ref(x0, params["branch0"])
    x1 = block_ref(x1, params["branch1"])
    f01, f10 = params["fuse01"], params["fuse10"]
    z01 = conv_bn_ref(x1, f01["w"], f01["s"], f01["b"])
    z01 = jnp.repeat(jnp.repeat(z01, 2, axis=1), 2, axis=2)
    y0 = jnp.maximum(x0 + z01, 0.0)
    z10 = conv_bn_ref(x0, f10["w"], f10["s"], f10["b"], stride=2)
    y1 = jnp.maximum(z10 + x1, 0.0)
    return [y0, y1]


# ----------------------------------------------------------------------------
# Deterministic parameter init (BN eval-mode stats folded into scale/bias)
# ----------------------------------------------------------------------------
def init_params(key):
    keys = iter(jax.random.split(key, 32))

    def conv_w(kh, kw, cin, cout):
        return 0.1 * jax.random.normal(next(keys), (kh, kw, cin, cout), jnp.float32)

    def bn_fold(c):
        gamma = 1.0 + 0.1 * jax.random.normal(next(keys), (c,), jnp.float32)
        beta = 0.1 * jax.random.normal(next(keys), (c,), jnp.float32)
        rm = jnp.zeros((c,), jnp.float32)
        rv = jnp.ones((c,), jnp.float32)
        scale = gamma / jnp.sqrt(rv + BN_EPS)
        bias = beta - rm * scale
        return scale, bias

    def basic_block_params(c):
        w1 = conv_w(3, 3, c, c); s1, b1 = bn_fold(c)
        w2 = conv_w(3, 3, c, c); s2, b2 = bn_fold(c)
        return {"w1": w1, "s1": s1, "b1": b1, "w2": w2, "s2": s2, "b2": b2}

    params = {
        "branch0": basic_block_params(4),
        "branch1": basic_block_params(8),
    }
    w = conv_w(1, 1, 8, 4); s, b = bn_fold(4)
    params["fuse01"] = {"w": w, "s": s, "b": b}          # 1x1 conv + BN + up x2
    w = conv_w(3, 3, 4, 8); s, b = bn_fold(8)
    params["fuse10"] = {"w": w, "s": s, "b": b}          # 3x3 stride-2 conv + BN
    return params


if __name__ == "__main__":
    key = jax.random.PRNGKey(0)
    kp, k0, k1 = jax.random.split(key, 3)
    params = init_params(kp)

    N, C0, H0, W0 = 2, 4, 16, 16
    C1, H1, W1 = 8, 8, 8

    # Inputs in PyTorch NCHW convention.
    x0_nchw = jax.random.normal(k0, (N, C0, H0, W0), jnp.float32)
    x1_nchw = jax.random.normal(k1, (N, C1, H1, W1), jnp.float32)

    forward = make_hr_module(params, N, H0, W0, C0, H1, W1, C1)
    y0, y1 = jax.block_until_ready(forward(x0_nchw, x1_nchw))

    # Reference in NHWC.
    x0_nhwc = jnp.transpose(x0_nchw, (0, 2, 3, 1))
    x1_nhwc = jnp.transpose(x1_nchw, (0, 2, 3, 1))
    r0, r1 = hr_module_forward_ref(params, x0_nhwc, x1_nhwc)

    for o, r in zip((y0, y1), (r0, r1)):
        assert o.shape == r.shape, (o.shape, r.shape)
        err = float(jnp.max(jnp.abs(o - r)))
        assert jnp.allclose(o, r, atol=5e-4, rtol=5e-4), err

    print("KERNEL_OK")
</pallas_src>

<mosaic_0001>
module attributes {stable_mosaic.version = 11 : i64} {
  func.func @_hr_module_kernel(%arg0: memref<16x128xf32, #tpu.memory_space<vmem>>, %arg1: memref<8x128xf32, #tpu.memory_space<vmem>>, %arg2: memref<3x128x128xf32, #tpu.memory_space<vmem>>, %arg3: memref<1x128xf32, #tpu.memory_space<vmem>>, %arg4: memref<3x128x128xf32, #tpu.memory_space<vmem>>, %arg5: memref<1x128xf32, #tpu.memory_space<vmem>>, %arg6: memref<3x16x16xf32, #tpu.memory_space<vmem>>, %arg7: memref<3x128x128xf32, #tpu.memory_space<vmem>>, %arg8: memref<1x128xf32, #tpu.memory_space<vmem>>, %arg9: memref<3x128x128xf32, #tpu.memory_space<vmem>>, %arg10: memref<1x128xf32, #tpu.memory_space<vmem>>, %arg11: memref<3x8x8xf32, #tpu.memory_space<vmem>>, %arg12: memref<128x128xf32, #tpu.memory_space<vmem>>, %arg13: memref<1x128xf32, #tpu.memory_space<vmem>>, %arg14: memref<16x8xf32, #tpu.memory_space<vmem>>, %arg15: memref<3x128x128xf32, #tpu.memory_space<vmem>>, %arg16: memref<1x128xf32, #tpu.memory_space<vmem>>, %arg17: memref<3x8x16xf32, #tpu.memory_space<vmem>>, %arg18: memref<16x128xf32, #tpu.memory_space<vmem>>, %arg19: memref<8x128xf32, #tpu.memory_space<vmem>>) attributes {dimension_semantics = [], scalar_prefetch = 0 : i64, scratch_operands = 0 : i64, tpu.core_type = #tpu.core_type<tc>} {
    %c0 = arith.constant 0 : index
    %c0_0 = arith.constant 0 : index
    %0 = vector.load %arg0[%c0, %c0_0] : memref<16x128xf32, #tpu.memory_space<vmem>>, vector<16x128xf32>
    %c0_1 = arith.constant 0 : index
    %c0_2 = arith.constant 0 : index
    %1 = vector.load %arg1[%c0_1, %c0_2] : memref<8x128xf32, #tpu.memory_space<vmem>>, vector<8x128xf32>
    %c0_3 = arith.constant 0 : index
    %c0_4 = arith.constant 0 : index
    %c0_5 = arith.constant 0 : index
    %2 = vector.load %arg6[%c0_3, %c0_4, %c0_5] : memref<3x16x16xf32, #tpu.memory_space<vmem>>, vector<1x16x16xf32>
    %3 = vector.shape_cast %2 : vector<1x16x16xf32> to vector<16x16xf32>
    %cst = arith.constant dense<0.000000e+00> : vector<16x128xf32>
    %4 = tpu.matmul %3, %0, %cst {dimension_numbers = #tpu.dot_dimension_numbers<[1], [0], [0], [1], [0, 0, 1, 1], [], []>} : vector<16x16xf32>, vector<16x128xf32>, vector<16x128xf32> -> vector<16x128xf32>
    %c0_6 = arith.constant 0 : index
    %c0_7 = arith.constant 0 : index
    %c0_8 = arith.constant 0 : index
    %5 = vector.load %arg2[%c0_6, %c0_7, %c0_8] : memref<3x128x128xf32, #tpu.memory_space<vmem>>, vector<1x128x128xf32>
    %6 = vector.shape_cast %5 : vector<1x128x128xf32> to vector<128x128xf32>
    %cst_9 = arith.constant dense<0.000000e+00> : vector<16x128xf32>
    %7 = tpu.matmul %4, %6, %cst_9 {dimension_numbers = #tpu.dot_dimension_numbers<[1], [0], [0], [1], [0, 0, 1, 1], [], []>} : vector<16x128xf32>, vector<128x128xf32>, vector<16x128xf32> -> vector<16x128xf32>
    %c1 = arith.constant 1 : index
    %c0_10 = arith.constant 0 : index
    %c0_11 = arith.constant 0 : index
    %8 = vector.load %arg6[%c1, %c0_10, %c0_11] : memref<3x16x16xf32, #tpu.memory_space<vmem>>, vector<1x16x16xf32>
    %9 = vector.shape_cast %8 : vector<1x16x16xf32> to vector<16x16xf32>
    %cst_12 = arith.constant dense<0.000000e+00> : vector<16x128xf32>
    %10 = tpu.matmul %9, %0, %cst_12 {dimension_numbers = #tpu.dot_dimension_numbers<[1], [0], [0], [1], [0, 0, 1, 1], [], []>} : vector<16x16xf32>, vector<16x128xf32>, vector<16x128xf32> -> vector<16x128xf32>
    %c1_13 = arith.constant 1 : index
    %c0_14 = arith.constant 0 : index
    %c0_15 = arith.constant 0 : index
    %11 = vector.load %arg2[%c1_13, %c0_14, %c0_15] : memref<3x128x128xf32, #tpu.memory_space<vmem>>, vector<1x128x128xf32>
    %12 = vector.shape_cast %11 : vector<1x128x128xf32> to vector<128x128xf32>
    %cst_16 = arith.constant dense<0.000000e+00> : vector<16x128xf32>
    %13 = tpu.matmul %10, %12, %cst_16 {dimension_numbers = #tpu.dot_dimension_numbers<[1], [0], [0], [1], [0, 0, 1, 1], [], []>} : vector<16x128xf32>, vector<128x128xf32>, vector<16x128xf32> -> vector<16x128xf32>
    %14 = arith.addf %7, %13 : vector<16x128xf32>
    %c2 = arith.constant 2 : index
    %c0_17 = arith.constant 0 : index
    %c0_18 = arith.constant 0 : index
    %15 = vector.load %arg6[%c2, %c0_17, %c0_18] : memref<3x16x16xf32, #tpu.memory_space<vmem>>, vector<1x16x16xf32>
    %16 = vector.shape_cast %15 : vector<1x16x16xf32> to vector<16x16xf32>
    %cst_19 = arith.constant dense<0.000000e+00> : vector<16x128xf32>
    %17 = tpu.matmul %16, %0, %cst_19 {dimension_numbers = #tpu.dot_dimension_numbers<[1], [0], [0], [1], [0, 0, 1, 1], [], []>} : vector<16x16xf32>, vector<16x128xf32>, vector<16x128xf32> -> vector<16x128xf32>
    %c2_20 = arith.constant 2 : index
    %c0_21 = arith.constant 0 : index
    %c0_22 = arith.constant 0 : index
    %18 = vector.load %arg2[%c2_20, %c0_21, %c0_22] : memref<3x128x128xf32, #tpu.memory_space<vmem>>, vector<1x128x128xf32>
    %19 = vector.shape_cast %18 : vector<1x128x128xf32> to vector<128x128xf32>
    %cst_23 = arith.constant dense<0.000000e+00> : vector<16x128xf32>
    %20 = tpu.matmul %17, %19, %cst_23 {dimension_numbers = #tpu.dot_dimension_numbers<[1], [0], [0], [1], [0, 0, 1, 1], [], []>} : vector<16x128xf32>, vector<128x128xf32>, vector<16x128xf32> -> vector<16x128xf32>
    %21 = arith.addf %14, %20 : vector<16x128xf32>
    %c0_24 = arith.constant 0 : index
    %c0_25 = arith.constant 0 : index
    %22 = vector.load %arg3[%c0_24, %c0_25] : memref<1x128xf32, #tpu.memory_space<vmem>>, vector<1x128xf32>
    %23 = vector.broadcast %22 : vector<1x128xf32> to vector<16x128xf32>
    %24 = arith.addf %21, %23 : vector<16x128xf32>
    %cst_26 = arith.constant 0.000000e+00 : f32
    %25 = vector.broadcast %cst_26 : f32 to vector<16x128xf32>
    %26 = arith.maximumf %24, %25 : vector<16x128xf32>
    %c0_27 = arith.constant 0 : index
    %c0_28 = arith.constant 0 : index
    %c0_29 = arith.constant 0 : index
    %27 = vector.load %arg6[%c0_27, %c0_28, %c0_29] : memref<3x16x16xf32, #tpu.memory_space<vmem>>, vector<1x16x16xf32>
    %28 = vector.shape_cast %27 : vector<1x16x16xf32> to vector<16x16xf32>
    %cst_30 = arith.constant dense<0.000000e+00> : vector<16x128xf32>
    %29 = tpu.matmul %28, %26, %cst_30 {dimension_numbers = #tpu.dot_dimension_numbers<[1], [0], [0], [1], [0, 0, 1, 1], [], []>} : vector<16x16xf32>, vector<16x128xf32>, vector<16x128xf32> -> vector<16x128xf32>
    %c0_31 = arith.constant 0 : index
    %c0_32 = arith.constant 0 : index
    %c0_33 = arith.constant 0 : index
    %30 = vector.load %arg4[%c0_31, %c0_32, %c0_33] : memref<3x128x128xf32, #tpu.memory_space<vmem>>, vector<1x128x128xf32>
    %31 = vector.shape_cast %30 : vector<1x128x128xf32> to vector<128x128xf32>
    %cst_34 = arith.constant dense<0.000000e+00> : vector<16x128xf32>
    %32 = tpu.matmul %29, %31, %cst_34 {dimension_numbers = #tpu.dot_dimension_numbers<[1], [0], [0], [1], [0, 0, 1, 1], [], []>} : vector<16x128xf32>, vector<128x128xf32>, vector<16x128xf32> -> vector<16x128xf32>
    %c1_35 = arith.constant 1 : index
    %c0_36 = arith.constant 0 : index
    %c0_37 = arith.constant 0 : index
    %33 = vector.load %arg6[%c1_35, %c0_36, %c0_37] : memref<3x16x16xf32, #tpu.memory_space<vmem>>, vector<1x16x16xf32>
    %34 = vector.shape_cast %33 : vector<1x16x16xf32> to vector<16x16xf32>
    %cst_38 = arith.constant dense<0.000000e+00> : vector<16x128xf32>
    %35 = tpu.matmul %34, %26, %cst_38 {dimension_numbers = #tpu.dot_dimension_numbers<[1], [0], [0], [1], [0, 0, 1, 1], [], []>} : vector<16x16xf32>, vector<16x128xf32>, vector<16x128xf32> -> vector<16x128xf32>
    %c1_39 = arith.constant 1 : index
    %c0_40 = arith.constant 0 : index
    %c0_41 = arith.constant 0 : index
    %36 = vector.load %arg4[%c1_39, %c0_40, %c0_41] : memref<3x128x128xf32, #tpu.memory_space<vmem>>, vector<1x128x128xf32>
    %37 = vector.shape_cast %36 : vector<1x128x128xf32> to vector<128x128xf32>
    %cst_42 = arith.constant dense<0.000000e+00> : vector<16x128xf32>
    %38 = tpu.matmul %35, %37, %cst_42 {dimension_numbers = #tpu.dot_dimension_numbers<[1], [0], [0], [1], [0, 0, 1, 1], [], []>} : vector<16x128xf32>, vector<128x128xf32>, vector<16x128xf32> -> vector<16x128xf32>
    %39 = arith.addf %32, %38 : vector<16x128xf32>
    %c2_43 = arith.constant 2 : index
    %c0_44 = arith.constant 0 : index
    %c0_45 = arith.constant 0 : index
    %40 = vector.load %arg6[%c2_43, %c0_44, %c0_45] : memref<3x16x16xf32, #tpu.memory_space<vmem>>, vector<1x16x16xf32>
    %41 = vector.shape_cast %40 : vector<1x16x16xf32> to vector<16x16xf32>
    %cst_46 = arith.constant dense<0.000000e+00> : vector<16x128xf32>
    %42 = tpu.matmul %41, %26, %cst_46 {dimension_numbers = #tpu.dot_dimension_numbers<[1], [0], [0], [1], [0, 0, 1, 1], [], []>} : vector<16x16xf32>, vector<16x128xf32>, vector<16x128xf32> -> vector<16x128xf32>
    %c2_47 = arith.constant 2 : index
    %c0_48 = arith.constant 0 : index
    %c0_49 = arith.constant 0 : index
    %43 = vector.load %arg4[%c2_47, %c0_48, %c0_49] : memref<3x128x128xf32, #tpu.memory_space<vmem>>, vector<1x128x128xf32>
    %44 = vector.shape_cast %43 : vector<1x128x128xf32> to vector<128x128xf32>
    %cst_50 = arith.constant dense<0.000000e+00> : vector<16x128xf32>
    %45 = tpu.matmul %42, %44, %cst_50 {dimension_numbers = #tpu.dot_dimension_numbers<[1], [0], [0], [1], [0, 0, 1, 1], [], []>} : vector<16x128xf32>, vector<128x128xf32>, vector<16x128xf32> -> vector<16x128xf32>
    %46 = arith.addf %39, %45 : vector<16x128xf32>
    %c0_51 = arith.constant 0 : index
    %c0_52 = arith.constant 0 : index
    %47 = vector.load %arg5[%c0_51, %c0_52] : memref<1x128xf32, #tpu.memory_space<vmem>>, vector<1x128xf32>
    %48 = vector.broadcast %47 : vector<1x128xf32> to vector<16x128xf32>
    %49 = arith.addf %46, %48 : vector<16x128xf32>
    %50 = arith.addf %49, %0 : vector<16x128xf32>
    %cst_53 = arith.constant 0.000000e+00 : f32
    %51 = vector.broadcast %cst_53 : f32 to vector<16x128xf32>
    %52 = arith.maximumf %50, %51 : vector<16x128xf32>
    %c0_54 = arith.constant 0 : index
    %c0_55 = arith.constant 0 : index
    %c0_56 = arith.constant 0 : index
    %53 = vector.load %arg11[%c0_54, %c0_55, %c0_56] : memref<3x8x8xf32, #tpu.memory_space<vmem>>, vector<1x8x8xf32>
    %54 = vector.shape_cast %53 : vector<1x8x8xf32> to vector<8x8xf32>
    %cst_57 = arith.constant dense<0.000000e+00> : vector<8x128xf32>
    %55 = tpu.matmul %54, %1, %cst_57 {dimension_numbers = #tpu.dot_dimension_numbers<[1], [0], [0], [1], [0, 0, 1, 1], [], []>} : vector<8x8xf32>, vector<8x128xf32>, vector<8x128xf32> -> vector<8x128xf32>
    %c0_58 = arith.constant 0 : index
    %c0_59 = arith.constant 0 : index
    %c0_60 = arith.constant 0 : index
    %56 = vector.load %arg7[%c0_58, %c0_59, %c0_60] : memref<3x128x128xf32, #tpu.memory_space<vmem>>, vector<1x128x128xf32>
    %57 = vector.shape_cast %56 : vector<1x128x128xf32> to vector<128x128xf32>
    %cst_61 = arith.constant dense<0.000000e+00> : vector<8x128xf32>
    %58 = tpu.matmul %55, %57, %cst_61 {dimension_numbers = #tpu.dot_dimension_numbers<[1], [0], [0], [1], [0, 0, 1, 1], [], []>} : vector<8x128xf32>, vector<128x128xf32>, vector<8x128xf32> -> vector<8x128xf32>
    %c1_62 = arith.constant 1 : index
    %c0_63 = arith.constant 0 : index
    %c0_64 = arith.constant 0 : index
    %59 = vector.load %arg11[%c1_62, %c0_63, %c0_64] : memref<3x8x8xf32, #tpu.memory_space<vmem>>, vector<1x8x8xf32>
    %60 = vector.shape_cast %59 : vector<1x8x8xf32> to vector<8x8xf32>
    %cst_65 = arith.constant dense<0.000000e+00> : vector<8x128xf32>
    %61 = tpu.matmul %60, %1, %cst_65 {dimension_numbers = #tpu.dot_dimension_numbers<[1], [0], [0], [1], [0, 0, 1, 1], [], []>} : vector<8x8xf32>, vector<8x128xf32>, vector<8x128xf32> -> vector<8x128xf32>
    %c1_66 = arith.constant 1 : index
    %c0_67 = arith.constant 0 : index
    %c0_68 = arith.constant 0 : index
    %62 = vector.load %arg7[%c1_66, %c0_67, %c0_68] : memref<3x128x128xf32, #tpu.memory_space<vmem>>, vector<1x128x128xf32>
    %63 = vector.shape_cast %62 : vector<1x128x128xf32> to vector<128x128xf32>
    %cst_69 = arith.constant dense<0.000000e+00> : vector<8x128xf32>
    %64 = tpu.matmul %61, %63, %cst_69 {dimension_numbers = #tpu.dot_dimension_numbers<[1], [0], [0], [1], [0, 0, 1, 1], [], []>} : vector<8x128xf32>, vector<128x128xf32>, vector<8x128xf32> -> vector<8x128xf32>
    %65 = arith.addf %58, %64 : vector<8x128xf32>
    %c2_70 = arith.constant 2 : index
    %c0_71 = arith.constant 0 : index
    %c0_72 = arith.constant 0 : index
    %66 = vector.load %arg11[%c2_70, %c0_71, %c0_72] : memref<3x8x8xf32, #tpu.memory_space<vmem>>, vector<1x8x8xf32>
    %67 = vector.shape_cast %66 : vector<1x8x8xf32> to vector<8x8xf32>
    %cst_73 = arith.constant dense<0.000000e+00> : vector<8x128xf32>
    %68 = tpu.matmul %67, %1, %cst_73 {dimension_numbers = #tpu.dot_dimension_numbers<[1], [0], [0], [1], [0, 0, 1, 1], [], []>} : vector<8x8xf32>, vector<8x128xf32>, vector<8x128xf32> -> vector<8x128xf32>
    %c2_74 = arith.constant 2 : index
    %c0_75 = arith.constant 0 : index
    %c0_76 = arith.constant 0 : index
    %69 = vector.load %arg7[%c2_74, %c0_75, %c0_76] : memref<3x128x128xf32, #tpu.memory_space<vmem>>, vector<1x128x128xf32>
    %70 = vector.shape_cast %69 : vector<1x128x128xf32> to vector<128x128xf32>
    %cst_77 = arith.constant dense<0.000000e+00> : vector<8x128xf32>
    %71 = tpu.matmul %68, %70, %cst_77 {dimension_numbers = #tpu.dot_dimension_numbers<[1], [0], [0], [1], [0, 0, 1, 1], [], []>} : vector<8x128xf32>, vector<128x128xf32>, vector<8x128xf32> -> vector<8x128xf32>
    %72 = arith.addf %65, %71 : vector<8x128xf32>
    %c0_78 = arith.constant 0 : index
    %c0_79 = arith.constant 0 : index
    %73 = vector.load %arg8[%c0_78, %c0_79] : memref<1x128xf32, #tpu.memory_space<vmem>>, vector<1x128xf32>
    %74 = vector.broadcast %73 : vector<1x128xf32> to vector<8x128xf32>
    %75 = arith.addf %72, %74 : vector<8x128xf32>
    %cst_80 = arith.constant 0.000000e+00 : f32
    %76 = vector.broadcast %cst_80 : f32 to vector<8x128xf32>
    %77 = arith.maximumf %75, %76 : vector<8x128xf32>
    %c0_81 = arith.constant 0 : index
    %c0_82 = arith.constant 0 : index
    %c0_83 = arith.constant 0 : index
    %78 = vector.load %arg11[%c0_81, %c0_82, %c0_83] : memref<3x8x8xf32, #tpu.memory_space<vmem>>, vector<1x8x8xf32>
    %79 = vector.shape_cast %78 : vector<1x8x8xf32> to vector<8x8xf32>
    %cst_84 = arith.constant dense<0.000000e+00> : vector<8x128xf32>
    %80 = tpu.matmul %79, %77, %cst_84 {dimension_numbers = #tpu.dot_dimension_numbers<[1], [0], [0], [1], [0, 0, 1, 1], [], []>} : vector<8x8xf32>, vector<8x128xf32>, vector<8x128xf32> -> vector<8x128xf32>
    %c0_85 = arith.constant 0 : index
    %c0_86 = arith.constant 0 : index
    %c0_87 = arith.constant 0 : index
    %81 = vector.load %arg9[%c0_85, %c0_86, %c0_87] : memref<3x128x128xf32, #tpu.memory_space<vmem>>, vector<1x128x128xf32>
    %82 = vector.shape_cast %81 : vector<1x128x128xf32> to vector<128x128xf32>
    %cst_88 = arith.constant dense<0.000000e+00> : vector<8x128xf32>
    %83 = tpu.matmul %80, %82, %cst_88 {dimension_numbers = #tpu.dot_dimension_numbers<[1], [0], [0], [1], [0, 0, 1, 1], [], []>} : vector<8x128xf32>, vector<128x128xf32>, vector<8x128xf32> -> vector<8x128xf32>
    %c1_89 = arith.constant 1 : index
    %c0_90 = arith.constant 0 : index
    %c0_91 = arith.constant 0 : index
    %84 = vector.load %arg11[%c1_89, %c0_90, %c0_91] : memref<3x8x8xf32, #tpu.memory_space<vmem>>, vector<1x8x8xf32>
    %85 = vector.shape_cast %84 : vector<1x8x8xf32> to vector<8x8xf32>
    %cst_92 = arith.constant dense<0.000000e+00> : vector<8x128xf32>
    %86 = tpu.matmul %85, %77, %cst_92 {dimension_numbers = #tpu.dot_dimension_numbers<[1], [0], [0], [1], [0, 0, 1, 1], [], []>} : vector<8x8xf32>, vector<8x128xf32>, vector<8x128xf32> -> vector<8x128xf32>
    %c1_93 = arith.constant 1 : index
    %c0_94 = arith.constant 0 : index
    %c0_95 = arith.constant 0 : index
    %87 = vector.load %arg9[%c1_93, %c0_94, %c0_95] : memref<3x128x128xf32, #tpu.memory_space<vmem>>, vector<1x128x128xf32>
    %88 = vector.shape_cast %87 : vector<1x128x128xf32> to vector<128x128xf32>
    %cst_96 = arith.constant dense<0.000000e+00> : vector<8x128xf32>
    %89 = tpu.matmul %86, %88, %cst_96 {dimension_numbers = #tpu.dot_dimension_numbers<[1], [0], [0], [1], [0, 0, 1, 1], [], []>} : vector<8x128xf32>, vector<128x128xf32>, vector<8x128xf32> -> vector<8x128xf32>
    %90 = arith.addf %83, %89 : vector<8x128xf32>
    %c2_97 = arith.constant 2 : index
    %c0_98 = arith.constant 0 : index
    %c0_99 = arith.constant 0 : index
    %91 = vector.load %arg11[%c2_97, %c0_98, %c0_99] : memref<3x8x8xf32, #tpu.memory_space<vmem>>, vector<1x8x8xf32>
    %92 = vector.shape_cast %91 : vector<1x8x8xf32> to vector<8x8xf32>
    %cst_100 = arith.constant dense<0.000000e+00> : vector<8x128xf32>
    %93 = tpu.matmul %92, %77, %cst_100 {dimension_numbers = #tpu.dot_dimension_numbers<[1], [0], [0], [1], [0, 0, 1, 1], [], []>} : vector<8x8xf32>, vector<8x128xf32>, vector<8x128xf32> -> vector<8x128xf32>
    %c2_101 = arith.constant 2 : index
    %c0_102 = arith.constant 0 : index
    %c0_103 = arith.constant 0 : index
    %94 = vector.load %arg9[%c2_101, %c0_102, %c0_103] : memref<3x128x128xf32, #tpu.memory_space<vmem>>, vector<1x128x128xf32>
    %95 = vector.shape_cast %94 : vector<1x128x128xf32> to vector<128x128xf32>
    %cst_104 = arith.constant dense<0.000000e+00> : vector<8x128xf32>
    %96 = tpu.matmul %93, %95, %cst_104 {dimension_numbers = #tpu.dot_dimension_numbers<[1], [0], [0], [1], [0, 0, 1, 1], [], []>} : vector<8x128xf32>, vector<128x128xf32>, vector<8x128xf32> -> vector<8x128xf32>
    %97 = arith.addf %90, %96 : vector<8x128xf32>
    %c0_105 = arith.constant 0 : index
    %c0_106 = arith.constant 0 : index
    %98 = vector.load %arg10[%c0_105, %c0_106] : memref<1x128xf32, #tpu.memory_space<vmem>>, vector<1x128xf32>
    %99 = vector.broadcast %98 : vector<1x128xf32> to vector<8x128xf32>
    %100 = arith.addf %97, %99 : vector<8x128xf32>
    %101 = arith.addf %100, %1 : vector<8x128xf32>
    %cst_107 = arith.constant 0.000000e+00 : f32
    %102 = vector.broadcast %cst_107 : f32 to vector<8x128xf32>
    %103 = arith.maximumf %101, %102 : vector<8x128xf32>
    %c0_108 = arith.constant 0 : index
    %c0_109 = arith.constant 0 : index
    %104 = vector.load %arg14[%c0_108, %c0_109] : memref<16x8xf32, #tpu.memory_space<vmem>>, vector<16x8xf32>
    %c0_110 = arith.constant 0 : index
    %c0_111 = arith.constant 0 : index
    %105 = vector.load %arg12[%c0_110, %c0_111] : memref<128x128xf32, #tpu.memory_space<vmem>>, vector<128x128xf32>
    %cst_112 = arith.constant dense<0.000000e+00> : vector<8x128xf32>
    %106 = tpu.matmul %103, %105, %cst_112 {dimension_numbers = #tpu.dot_dimension_numbers<[1], [0], [0], [1], [0, 0, 1, 1], [], []>} : vector<8x128xf32>, vector<128x128xf32>, vector<8x128xf32> -> vector<8x128xf32>
    %cst_113 = arith.constant dense<0.000000e+00> : vector<16x128xf32>
    %107 = tpu.matmul %104, %106, %cst_113 {dimension_numbers = #tpu.dot_dimension_numbers<[1], [0], [0], [1], [0, 0, 1, 1], [], []>} : vector<16x8xf32>, vector<8x128xf32>, vector<16x128xf32> -> vector<16x128xf32>
    %c0_114 = arith.constant 0 : index
    %c0_115 = arith.constant 0 : index
    %108 = vector.load %arg13[%c0_114, %c0_115] : memref<1x128xf32, #tpu.memory_space<vmem>>, vector<1x128xf32>
    %109 = vector.broadcast %108 : vector<1x128xf32> to vector<16x128xf32>
    %110 = arith.addf %107, %109 : vector<16x128xf32>
    %111 = arith.addf %52, %110 : vector<16x128xf32>
    %cst_116 = arith.constant 0.000000e+00 : f32
    %112 = vector.broadcast %cst_116 : f32 to vector<16x128xf32>
    %113 = arith.maximumf %111, %112 : vector<16x128xf32>
    %c0_117 = arith.constant 0 : index
    %c0_118 = arith.constant 0 : index
    %114 = vector.load %arg18[%c0_117, %c0_118] : memref<16x128xf32, #tpu.memory_space<vmem>>, vector<16x128xf32>
    tpu.vector_store %arg18[%c0_117, %c0_118], %113 {strides = array<i32>} : memref<16x128xf32, #tpu.memory_space<vmem>>, vector<16x128xf32>,
    %c0_119 = arith.constant 0 : index
    %c0_120 = arith.constant 0 : index
    %c0_121 = arith.constant 0 : index
    %115 = vector.load %arg17[%c0_119, %c0_120, %c0_121] : memref<3x8x16xf32, #tpu.memory_space<vmem>>, vector<1x8x16xf32>
    %116 = vector.shape_cast %115 : vector<1x8x16xf32> to vector<8x16xf32>
    %cst_122 = arith.constant dense<0.000000e+00> : vector<8x128xf32>
    %117 = tpu.matmul %116, %52, %cst_122 {dimension_numbers = #tpu.dot_dimension_numbers<[1], [0], [0], [1], [0, 0, 1, 1], [], []>} : vector<8x16xf32>, vector<16x128xf32>, vector<8x128xf32> -> vector<8x128xf32>
    %c0_123 = arith.constant 0 : index
    %c0_124 = arith.constant 0 : index
    %c0_125 = arith.constant 0 : index
    %118 = vector.load %arg15[%c0_123, %c0_124, %c0_125] : memref<3x128x128xf32, #tpu.memory_space<vmem>>, vector<1x128x128xf32>
    %119 = vector.shape_cast %118 : vector<1x128x128xf32> to vector<128x128xf32>
    %cst_126 = arith.constant dense<0.000000e+00> : vector<8x128xf32>
    %120 = tpu.matmul %117, %119, %cst_126 {dimension_numbers = #tpu.dot_dimension_numbers<[1], [0], [0], [1], [0, 0, 1, 1], [], []>} : vector<8x128xf32>, vector<128x128xf32>, vector<8x128xf32> -> vector<8x128xf32>
    %c1_127 = arith.constant 1 : index
    %c0_128 = arith.constant 0 : index
    %c0_129 = arith.constant 0 : index
    %121 = vector.load %arg17[%c1_127, %c0_128, %c0_129] : memref<3x8x16xf32, #tpu.memory_space<vmem>>, vector<1x8x16xf32>
    %122 = vector.shape_cast %121 : vector<1x8x16xf32> to vector<8x16xf32>
    %cst_130 = arith.constant dense<0.000000e+00> : vector<8x128xf32>
    %123 = tpu.matmul %122, %52, %cst_130 {dimension_numbers = #tpu.dot_dimension_numbers<[1], [0], [0], [1], [0, 0, 1, 1], [], []>} : vector<8x16xf32>, vector<16x128xf32>, vector<8x128xf32> -> vector<8x128xf32>
    %c1_131 = arith.constant 1 : index
    %c0_132 = arith.constant 0 : index
    %c0_133 = arith.constant 0 : index
    %124 = vector.load %arg15[%c1_131, %c0_132, %c0_133] : memref<3x128x128xf32, #tpu.memory_space<vmem>>, vector<1x128x128xf32>
    %125 = vector.shape_cast %124 : vector<1x128x128xf32> to vector<128x128xf32>
    %cst_134 = arith.constant dense<0.000000e+00> : vector<8x128xf32>
    %126 = tpu.matmul %123, %125, %cst_134 {dimension_numbers = #tpu.dot_dimension_numbers<[1], [0], [0], [1], [0, 0, 1, 1], [], []>} : vector<8x128xf32>, vector<128x128xf32>, vector<8x128xf32> -> vector<8x128xf32>
    %127 = arith.addf %120, %126 : vector<8x128xf32>
    %c2_135 = arith.constant 2 : index
    %c0_136 = arith.constant 0 : index
    %c0_137 = arith.constant 0 : index
    %128 = vector.load %arg17[%c2_135, %c0_136, %c0_137] : memref<3x8x16xf32, #tpu.memory_space<vmem>>, vector<1x8x16xf32>
    %129 = vector.shape_cast %128 : vector<1x8x16xf32> to vector<8x16xf32>
    %cst_138 = arith.constant dense<0.000000e+00> : vector<8x128xf32>
    %130 = tpu.matmul %129, %52, %cst_138 {dimension_numbers = #tpu.dot_dimension_numbers<[1], [0], [0], [1], [0, 0, 1, 1], [], []>} : vector<8x16xf32>, vector<16x128xf32>, vector<8x128xf32> -> vector<8x128xf32>
    %c2_139 = arith.constant 2 : index
    %c0_140 = arith.constant 0 : index
    %c0_141 = arith.constant 0 : index
    %131 = vector.load %arg15[%c2_139, %c0_140, %c0_141] : memref<3x128x128xf32, #tpu.memory_space<vmem>>, vector<1x128x128xf32>
    %132 = vector.shape_cast %131 : vector<1x128x128xf32> to vector<128x128xf32>
    %cst_142 = arith.constant dense<0.000000e+00> : vector<8x128xf32>
    %133 = tpu.matmul %130, %132, %cst_142 {dimension_numbers = #tpu.dot_dimension_numbers<[1], [0], [0], [1], [0, 0, 1, 1], [], []>} : vector<8x128xf32>, vector<128x128xf32>, vector<8x128xf32> -> vector<8x128xf32>
    %134 = arith.addf %127, %133 : vector<8x128xf32>
    %c0_143 = arith.constant 0 : index
    %c0_144 = arith.constant 0 : index
    %135 = vector.load %arg16[%c0_143, %c0_144] : memref<1x128xf32, #tpu.memory_space<vmem>>, vector<1x128xf32>
    %136 = vector.broadcast %135 : vector<1x128xf32> to vector<8x128xf32>
    %137 = arith.addf %134, %136 : vector<8x128xf32>
    %138 = arith.addf %137, %103 : vector<8x128xf32>
    %cst_145 = arith.constant 0.000000e+00 : f32
    %139 = vector.broadcast %cst_145 : f32 to vector<8x128xf32>
    %140 = arith.maximumf %138, %139 : vector<8x128xf32>
    %c0_146 = arith.constant 0 : index
    %c0_147 = arith.constant 0 : index
    %141 = vector.load %arg19[%c0_146, %c0_147] : memref<8x128xf32, #tpu.memory_space<vmem>>, vector<8x128xf32>
    tpu.vector_store %arg19[%c0_146, %c0_147], %140 {strides = array<i32>} : memref<8x128xf32, #tpu.memory_space<vmem>>, vector<8x128xf32>,
    return
  }
}

</mosaic_0001>

<bundles_post_ra>
// kernel: forward.1
= control target key start
LH: loop header
LB: loop body
LE: loop exit
PB: predicated region body
PF: predicated region fallthrough
CT: control target
= control target key end

     0   :  { %s4993_s0 = inlined_call_operand.vmem [shape: f32[16,128], index: 0, kind: input, shape index: {}]   ;;  %s4994_s1 = inlined_call_operand.vmem [shape: f32[8,128], index: 1, kind: input, shape index: {}]   ;;  %s4995_s2 = inlined_call_operand.hbm [shape: f32[3,128,128], index: 2, kind: input, shape index: {}]   ;;  %s4996_s3 = inlined_call_operand.hbm [shape: f32[1,128], index: 3, kind: input, shape index: {}]   ;;  %s4997_s4 = inlined_call_operand.hbm [shape: f32[3,128,128], index: 4, kind: input, shape index: {}]   ;;  %s4998_s5 = inlined_call_operand.hbm [shape: f32[1,128], index: 5, kind: input, shape index: {}]   ;;  %s4999_s6 = inlined_call_operand.hbm [shape: f32[3,16,16], index: 6, kind: input, shape index: {}]   ;;  %s5000_s7 = inlined_call_operand.hbm [shape: f32[3,128,128], index: 7, kind: input, shape index: {}]   ;;  %s5001_s8 = inlined_call_operand.vmem [shape: f32[1,128], index: 8, kind: input, shape index: {}]   ;;  %s5002_s9 = inlined_call_operand.vmem [shape: f32[3,128,128], index: 9, kind: input, shape index: {}]   ;;  %s5003_s10 = inlined_call_operand.vmem [shape: f32[1,128], index: 10, kind: input, shape index: {}]   ;;  %s5004_s11 = inlined_call_operand.hbm [shape: f32[3,8,8], index: 11, kind: input, shape index: {}]   ;;  %s5005_s12 = inlined_call_operand.hbm [shape: f32[128,128], index: 12, kind: input, shape index: {}]   ;;  %s5006_s13 = inlined_call_operand.vmem [shape: f32[1,128], index: 13, kind: input, shape index: {}]   ;;  %s5007_s14 = inlined_call_operand.vmem [shape: f32[16,8], index: 14, kind: input, shape index: {}]   ;;  %s5008_s15 = inlined_call_operand.vmem [shape: f32[3,128,128], index: 15, kind: input, shape index: {}]   ;;  %s5009_s16 = inlined_call_operand.vmem [shape: f32[1,128], index: 16, kind: input, shape index: {}]   ;;  %s5010_s17 = inlined_call_operand.vmem [shape: f32[3,8,16], index: 17, kind: input, shape index: {}]   ;;  %s5011_s18 = inlined_call_operand.vmem [shape: f32[16,128], index: 18, kind: output, shape index: {0}]   ;;  %s5012_s19 = inlined_call_operand.vmem [shape: f32[8,128], index: 19, kind: output, shape index: {1}]  }
   0x1   :  { %5014 = sst [smem:[#allocation20_spill]] %s4993_s0 }
   0x2   :  { %5015 = sst [smem:[#allocation21_spill]] %s4994_s1 }
   0x3   :  { %5016 = sst [smem:[#allocation22_spill]] %s4995_s2 }
   0x4   :  { %5017 = sst [smem:[#allocation23_spill]] %s4996_s3 }
   0x5   :  { %25 = vsyncpa [#allocation3], 0 }
   0x6   :  { %26 = vsyncpa [#allocation5], 0 }
   0x7   :  { %27 = vsyncpa [#allocation8], 0 }
   0x8   :  { %28 = vsyncpa [#allocation11], 0 }
   0x9   :  { %29 = vsyncpa [#allocation14], 0  ;;  %s4154_s0 = smov [#allocation4]   ;;  %s4155_s20 = smov [#allocation7]  }
   0xa   :  { %s52_s30 = sshll.u32 %s4154_s0, 4  ;;  %s74_s21 = sshll.u32 %s4155_s20, 4  ;;  %s53_s30 = int_to_ptr.vmem [resolvable:$true] %s52_s30  ;;  %s75_s21 = int_to_ptr.vmem [resolvable:$true] %s74_s21 }
   0xb   :  { %s3992_s1 = scalar_lea.vmem %s53_s30, 16  ;;  %s3996_s22 = scalar_lea.vmem %s53_s30, 32 }
   0xc   :  { %p3993_p0 = scmp.ne.s32.totalorder %s53_s30, %s3992_s1  ;;  %p3997_p1 = scmp.lt.s32.totalorder %s53_s30, %s53_s30 }
   0xd   :  { %p3998_p2 = scmp.lt.s32.totalorder %s3996_s22, %s3992_s1 }
   0xf   :  { %p3999_p3 = por %p3998_p2, %p3997_p1 }
  0x11   :  { %p4000_p4 = pnand %p3999_p3, %p3993_p0 }
  0x13   :  { %4003 = shalt.err (!%p4000_p4)
}
  0x14   :  { %s5018_s24 = sld [smem:[#allocation23_spill]]  ;;  %s4012_s25 = scalar_lea.vmem %s75_s21, 16 }
  0x15   :  { %p4013_p5 = scmp.ne.s32.totalorder %s75_s21, %s4012_s25  ;;  %s4016_s3 = scalar_lea.vmem %s75_s21, 32 }
  0x16   :  { %p4017_p6 = scmp.lt.s32.totalorder %s75_s21, %s75_s21  ;;  %p4018_p7 = scmp.lt.s32.totalorder %s4016_s3, %s4012_s25 }
  0x18   :  { %p4019_p8 = por %p4018_p7, %p4017_p6 }
  0x1a   :  { %55 = dma.hbm_to_vmem [thread:$0]  %s5018_s24, 16, %s53_s30, [#allocation5]  }
  0x1b   :  { %p4020_p9 = pnand %p4019_p8, %p4013_p5 }
  0x1d   :  { %4023 = shalt.err (!%p4020_p9)
}
  0x1e   :  { %77 = dma.hbm_to_vmem [thread:$0]  %s4998_s5, 16, %s75_s21, [#allocation8]  }
  0x1f   :  { %s4156_s28 = smov [#allocation10]   ;;  %s4157_s0 = smov [#allocation2]  }
  0x20   :  { %s95_s29 = sshll.u32 %s4156_s28, 4  ;;  %s39_s20 = sshll.u32 %s4157_s0, 4  ;;  %s96_s29 = int_to_ptr.vmem [resolvable:$true] %s95_s29  ;;  %s40_s20 = int_to_ptr.vmem [resolvable:$true] %s39_s20 }
  0x21   :  { %s4032_s1 = scalar_lea.vmem %s96_s29, 6144  ;;  %p4037_p11 = scmp.lt.s32.totalorder %s96_s29, %s96_s29 }
  0x22   :  { %p4033_p10 = scmp.ne.s32.totalorder %s96_s29, %s4032_s1  ;;  %p4038_p12 = scmp.lt.s32.totalorder %s4032_s1, %s4032_s1 }
  0x24   :  { %p4039_p13 = por %p4038_p12, %p4037_p11 }
  0x26   :  { %p4040_p0 = pnand %p4039_p13, %p4033_p10 }
  0x28   :  { %4043 = shalt.err (!%p4040_p0)
}
  0x29   :  { %s4158_s30 = smov 128   ;;  %s4159_s22 = smov 8  }
  0x2a   :  { %101 = dma.hbm_to_vmem [thread:$0]  %s5000_s7, 6144, %s96_s29, [#allocation11], %s4158_s30, %s4158_s30, %s4159_s22  }
  0x2b   :  { %s4052_s21 = scalar_lea.vmem %s40_s20, 6144  ;;  %p4057_p2 = scmp.lt.s32.totalorder %s40_s20, %s40_s20 }
  0x2c   :  { %p4053_p1 = scmp.ne.s32.totalorder %s40_s20, %s4052_s21  ;;  %p4058_p3 = scmp.lt.s32.totalorder %s4052_s21, %s4052_s21 }
  0x2e   :  { %p4059_p4 = por %p4058_p3, %p4057_p2 }
  0x30   :  { %p4060_p5 = pnand %p4059_p4, %p4053_p1 }
  0x32   :  { %4063 = shalt.err (!%p4060_p5)
}
  0x33   :  { %s5019_s25 = sld [smem:[#allocation22_spill]]  ;;  %s4160_s3 = smov [#allocation6]  }
  0x34   :  { %s61_s26 = sshll.u32 %s4160_s3, 4  ;;  %s4161_s27 = smov [#allocation9]   ;;  %s62_s26 = int_to_ptr.vmem [resolvable:$true] %s61_s26 }
  0x35   :  { %s83_s28 = sshll.u32 %s4161_s27, 4  ;;  %s4072_s7 = scalar_lea.vmem %s62_s26, 6144  ;;  %s84_s28 = int_to_ptr.vmem [resolvable:$true] %s83_s28 }
  0x36   :  { %p4073_p6 = scmp.ne.s32.totalorder %s62_s26, %s4072_s7  ;;  %p4077_p7 = scmp.lt.s32.totalorder %s62_s26, %s62_s26 }
  0x37   :  { %p4078_p8 = scmp.lt.s32.totalorder %s4072_s7, %s4072_s7 }
  0x39   :  { %45 = dma.hbm_to_vmem [thread:$0]  %s5019_s25, 6144, %s40_s20, [#allocation3], %s4158_s30, %s4158_s30, %s4159_s22  }
  0x3a   :  { %p4079_p9 = por %p4078_p8, %p4077_p7 }
  0x3c   :  { %p4080_p10 = pnand %p4079_p9, %p4073_p6 }
  0x3e   :  { %4083 = shalt.err (!%p4080_p10)
}
  0x3f   :  { %67 = dma.hbm_to_vmem [thread:$0]  %s4997_s4, 6144, %s62_s26, [#allocation5], %s4158_s30, %s4158_s30, %s4159_s22  }
  0x40   :  { %s4092_s20 = scalar_lea.vmem %s84_s28, 768  ;;  %p4097_p12 = scmp.lt.s32.totalorder %s84_s28, %s84_s28 }
  0x41   :  { %p4093_p11 = scmp.ne.s32.totalorder %s84_s28, %s4092_s20  ;;  %p4098_p13 = scmp.lt.s32.totalorder %s4092_s20, %s4092_s20 }
  0x43   :  { %p4099_p0 = por %p4098_p13, %p4097_p12 }
  0x45   :  { %p4100_p1 = pnand %p4099_p0, %p4093_p11 }
  0x47   :  { %4103 = shalt.err (!%p4100_p1)
}
  0x48   :  { %89 = dma.hbm_to_vmem [thread:$0]  %s4999_s6, 768, %s84_s28, [#allocation8], %s4158_s30, %s4158_s30, %s4159_s22  }
  0x49   :  { %s4162_s5 = smov [#allocation12]   ;;  %s4163_s23 = smov [#allocation13]  }
  0x4a   :  { %s113_s21 = sshll.u32 %s4162_s5, 4  ;;  %s125_s24 = sshll.u32 %s4163_s23, 4  ;;  %s114_s21 = int_to_ptr.vmem [resolvable:$true] %s113_s21  ;;  %s126_s24 = int_to_ptr.vmem [resolvable:$true] %s125_s24 }
  0x4b   :  { %s4112_s4 = scalar_lea.vmem %s114_s21, 384  ;;  %p4117_p3 = scmp.lt.s32.totalorder %s114_s21, %s114_s21 }
  0x4c   :  { %p4113_p2 = scmp.ne.s32.totalorder %s114_s21, %s4112_s4  ;;  %p4118_p4 = scmp.lt.s32.totalorder %s4112_s4, %s4112_s4 }
  0x4e   :  { %p4119_p5 = por %p4118_p4, %p4117_p3 }
  0x50   :  { %p4120_p6 = pnand %p4119_p5, %p4113_p2 }
  0x52   :  { %4123 = shalt.err (!%p4120_p6)
}
  0x53   :  { %119 = dma.hbm_to_vmem [thread:$0]  %s5004_s11, 384, %s114_s21, [#allocation11], %s4158_s30, %s4158_s30, %s4159_s22  }
  0x54   :  { %s4132_s6 = scalar_lea.vmem %s126_s24, 2048  ;;  %p4137_p8 = scmp.lt.s32.totalorder %s126_s24, %s126_s24 }
  0x55   :  { %p4133_p7 = scmp.ne.s32.totalorder %s126_s24, %s4132_s6  ;;  %p4138_p9 = scmp.lt.s32.totalorder %s4132_s6, %s4132_s6 }
  0x57   :  { %p4139_p10 = por %p4138_p9, %p4137_p8 }
  0x59   :  { %p4140_p11 = pnand %p4139_p10, %p4133_p7 }
  0x5b   :  { %4143 = shalt.err (!%p4140_p11)
}
  0x5c   :  { %131 = dma.hbm_to_vmem [thread:$0]  %s5005_s12, 2048, %s126_s24, [#allocation14], %s4158_s30, %s4158_s30, %s4159_s22  }
  0x5d   :  { %4144 = dma.done.wait [#allocation3], 6144  }
  0x5e   :  { %4145 = vsyncadd [#allocation3], 4294961152 }
  0x5f   :  { %4146 = dma.done.wait [#allocation5], 6160  }
  0x60   :  { %4147 = vsyncadd [#allocation5], 4294961136 }
  0x61   :  { %4148 = dma.done.wait [#allocation8], 784  }
  0x62   :  { %4149 = vsyncadd [#allocation8], 4294966512 }
  0x63   :  { %4150 = dma.done.wait [#allocation11], 6528  }
  0x64   :  { %4151 = vsyncadd [#allocation11], 4294960768 }
  0x65   :  { %4152 = dma.done.wait [#allocation14], 2048  }
  0x66   :  { %4153 = vsyncadd [#allocation14], 4294965248  ;;  %vm171_vm0 = vcmask 130048   ;;  %s5020_s7 = sld [smem:[#allocation20_spill]]  ;;  %v4318_v2 = vld [vmem:[#allocation9] sm:$0xff]  ;;  %v4324_v3 = vld [vmem:[#allocation9 + $0x8] sm:$0xff] }
  0x67   :  { %3316 = vmatprep.mubr.msk.f32.mxu1 %vm171_vm0, %v4318_v2  ;;  %v369_v4 = vld [vmem:[#allocation2 + $0xf8] sm:$0xff]  ;;  %v368_v6 = vld [vmem:[#allocation2 + $0xf0] sm:$0xff]  ;;  %v367_v9 = vld [vmem:[#allocation2 + $0xe8] sm:$0xff]  ;;  %s5021_s22 = sld [smem:[#allocation21_spill]]  ;;  %vm4165_vm1 = vmmov 0   ;;  %vm1225_vm2 = vcmask 64512  }
  0x68   :  { %v4327_v5 = vld [vmem:[#allocation9 + $0x10] sm:$0xff]  ;;  %3326 = vmatprep.subr.mxu0 %v369_v4  ;;  %v4336_v7 = vld [vmem:[#allocation9 + $0x18] sm:$0xff]  ;;  %v266_v12 = vld [vmem:[#allocation2 + $0x68] sm:$0xff] }
  0x69   :  { %3327 = vmatpush3.msra.mxu0 %v369_v4  ;;  %v268_v8 = vld [vmem:[#allocation2 + $0x78] sm:$0xff]  ;;  %v267_v10 = vld [vmem:[#allocation2 + $0x70] sm:$0xff]  ;;  %v366_v11 = vld [vmem:[#allocation2 + $0xe0] sm:$0xff] }
  0x6a   :  { %3328 = vmatprep.subr.mxu0 %v368_v6  ;;  %v365_v13 = vld [vmem:[#allocation2 + $0xd8] sm:$0xff]  ;;  %v265_v14 = vld [vmem:[#allocation2 + $0x60] sm:$0xff]  ;;  %v364_v15 = vld [vmem:[#allocation2 + $0xd0] sm:$0xff] }
  0x6b   :  { %3329 = vmatpush3.msra.mxu0 %v368_v6  ;;  %v264_v16 = vld [vmem:[#allocation2 + $0x58] sm:$0xff]  ;;  %v363_v17 = vld [vmem:[#allocation2 + $0xc8] sm:$0xff]  ;;  %v263_v18 = vld [vmem:[#allocation2 + $0x50] sm:$0xff] }
  0x6c   :  { %v4311_v0 = vld [vmem:[%s5020_s7 + $0x8] sm:$0xff]  ;;  %v4316_v1 = vld [vmem:[%s5020_s7] sm:$0xff]  ;;  %3330 = vmatprep.subr.mxu0 %v367_v9  ;;  %v361_v21 = vld [vmem:[#allocation2 + $0xb8] sm:$0xff] }
  0x6d   :  { %3312 = vmatprep.subr.mxu1 %v4311_v0  ;;  %3331 = vmatpush3.msra.mxu0 %v367_v9  ;;  %v362_v19 = vld [vmem:[#allocation2 + $0xc0] sm:$0xff]  ;;  %v262_v20 = vld [vmem:[#allocation2 + $0x48] sm:$0xff]  ;;  %v360_v23 = vld [vmem:[#allocation2 + $0xb0] sm:$0xff] }
  0x6e   :  { %3313 = vmatpush3.msra.mxu1 %v4311_v0  ;;  %3332 = vmatprep.subr.mxu0 %v366_v11  ;;  %v261_v22 = vld [vmem:[#allocation2 + $0x40] sm:$0xff]  ;;  %v260_v24 = vld [vmem:[#allocation2 + $0x38] sm:$0xff]  ;;  %v359_v25 = vld [vmem:[#allocation2 + $0xa8] sm:$0xff] }
  0x6f   :  { %3314 = vmatprep.subr.mxu1 %v4316_v1  ;;  %3333 = vmatpush3.msra.mxu0 %v366_v11  ;;  %v259_v26 = vld [vmem:[#allocation2 + $0x30] sm:$0xff]  ;;  %v358_v27 = vld [vmem:[#allocation2 + $0xa0] sm:$0xff]  ;;  %v258_v28 = vld [vmem:[#allocation2 + $0x28] sm:$0xff] }
  0x70   :  { %3315 = vmatpush3.msra.mxu1 %v4316_v1  ;;  %3334 = vmatprep.subr.mxu0 %v365_v13  ;;  %v257_v29 = vld [vmem:[#allocation2 + $0x20] sm:$0xff]  ;;  %v256_v30 = vld [vmem:[#allocation2 + $0x18] sm:$0xff]  ;;  %v255_v31 = vld [vmem:[#allocation2 + $0x10] sm:$0xff] }
  0x71   :  { %3317 = vmatmul.mubr.msk.f32.vlgmr.msra.gmra.mxu1 %vm171_vm0, %v4324_v3  ;;  %3319 = vmatprep.subr.mxu1 %v4311_v0  ;;  %v357_v32 = vld [vmem:[#allocation2 + $0x98] sm:$0xff]  ;;  %v254_v33 = vld [vmem:[#allocation2 + $0x8] sm:$0xff]  ;;  %v356_v34 = vld [vmem:[#allocation2 + $0x90] sm:$0xff] }
  0x72   :  { %3320 = vmatpush3.msra.mxu1 %v4311_v0  ;;  %3323 = vmatprep.mubr.msk.f32.mxu1 %vm171_vm0, %v4327_v5  ;;  %v253_v35 = vld [vmem:[#allocation2] sm:$0xff]  ;;  %v355_v36 = vld [vmem:[#allocation2 + $0x88] sm:$0xff]  ;;  %v620_v44 = vld [vmem:[#allocation2 + $0x178] sm:$0xff] }
  0x73   :  { %3321 = vmatprep.subr.mxu1 %v4316_v1  ;;  %3335 = vmatpush3.msra.mxu0 %v365_v13  ;;  %v354_v37 = vld [vmem:[#allocation2 + $0x80] sm:$0xff]  ;;  %v4348_v42 = vld [vmem:[#allocation9 + $0x28] sm:$0xff]  ;;  %v616_v48 = vld [vmem:[#allocation2 + $0x158] sm:$0xff] }
  0x74   :  { %3322 = vmatpush3.msra.mxu1 %v4316_v1  ;;  %3336 = vmatprep.subr.mxu0 %v364_v15  ;;  %v4343_v40 = vld [vmem:[#allocation9 + $0x20] sm:$0xff]  ;;  %v619_v45 = vld [vmem:[#allocation2 + $0x170] sm:$0xff]  ;;  %v612_v52 = vld [vmem:[#allocation2 + $0x138] sm:$0xff] }
  0x75   :  { %3324 = vmatmul.mubr.msk.f32.vlgmr.msra.gmra.mxu1 %vm171_vm0, %v4336_v7  ;;  %3361 = vmatprep.subr.mxu1 %v268_v8  ;;  %v618_v46 = vld [vmem:[#allocation2 + $0x168] sm:$0xff]  ;;  %v617_v47 = vld [vmem:[#allocation2 + $0x160] sm:$0xff]  ;;  %v615_v49 = vld [vmem:[#allocation2 + $0x150] sm:$0xff] }
  0x76   :  { %3362 = vmatpush3.msra.mxu1 %v268_v8  ;;  %3337 = vmatpush3.msra.mxu0 %v364_v15  ;;  %v614_v50 = vld [vmem:[#allocation2 + $0x148] sm:$0xff]  ;;  %v613_v51 = vld [vmem:[#allocation2 + $0x140] sm:$0xff]  ;;  %v611_v53 = vld [vmem:[#allocation2 + $0x130] sm:$0xff] }
  0x77   :  { %3363 = vmatprep.subr.mxu1 %v267_v10  ;;  %3338 = vmatprep.subr.mxu0 %v363_v17  ;;  %v610_v54 = vld [vmem:[#allocation2 + $0x128] sm:$0xff]  ;;  %v609_v55 = vld [vmem:[#allocation2 + $0x120] sm:$0xff]  ;;  %v608_v56 = vld [vmem:[#allocation2 + $0x118] sm:$0xff] }
  0x78   :  { %3364 = vmatpush3.msra.mxu1 %v267_v10  ;;  %3339 = vmatpush3.msra.mxu0 %v363_v17  ;;  %v607_v57 = vld [vmem:[#allocation2 + $0x110] sm:$0xff]  ;;  %v606_v58 = vld [vmem:[#allocation2 + $0x108] sm:$0xff]  ;;  %v605_v59 = vld [vmem:[#allocation2 + $0x100] sm:$0xff] }
  0x79   :  { %3365 = vmatprep.subr.mxu1 %v266_v12  ;;  %3340 = vmatprep.subr.mxu0 %v362_v19  ;;  %v891_v60 = vld [vmem:[#allocation6 + $0xf8] sm:$0xff]  ;;  %v890_v61 = vld [vmem:[#allocation6 + $0xf0] sm:$0xff]  ;;  %v889_v62 = vld [vmem:[#allocation6 + $0xe8] sm:$0xff] }
  0x7a   :  { %3366 = vmatpush3.msra.mxu1 %v266_v12  ;;  %3341 = vmatpush3.msra.mxu0 %v362_v19  ;;  %v888_v63 = vld [vmem:[#allocation6 + $0xe0] sm:$0xff]  ;;  %v885_v4 = vld [vmem:[#allocation6 + $0xc8] sm:$0xff]  ;;  %v883_v8 = vld [vmem:[#allocation6 + $0xb8] sm:$0xff] }
  0x7b   :  { %3367 = vmatprep.subr.mxu1 %v265_v14  ;;  %3342 = vmatprep.subr.mxu0 %v361_v21  ;;  %v884_v6 = vld [vmem:[#allocation6 + $0xc0] sm:$0xff]  ;;  %v882_v9 = vld [vmem:[#allocation6 + $0xb0] sm:$0xff]  ;;  %v881_v10 = vld [vmem:[#allocation6 + $0xa8] sm:$0xff] }
  0x7c   :  { %3368 = vmatpush3.msra.mxu1 %v265_v14  ;;  %3343 = vmatpush3.msra.mxu0 %v361_v21  ;;  %v880_v11 = vld [vmem:[#allocation6 + $0xa0] sm:$0xff]  ;;  %v879_v12 = vld [vmem:[#allocation6 + $0x98] sm:$0xff]  ;;  %v878_v17 = vld [vmem:[#allocation6 + $0x90] sm:$0xff] }
  0x7d   :  { %3369 = vmatprep.subr.mxu1 %v264_v16  ;;  %3344 = vmatprep.subr.mxu0 %v360_v23  ;;  %v876_v19 = vld [vmem:[#allocation6 + $0x80] sm:$0xff] }
  0x7e   :  { %3370 = vmatpush3.msra.mxu1 %v264_v16  ;;  %3345 = vmatpush3.msra.mxu0 %v360_v23 }
  0x7f   :  { %3371 = vmatprep.subr.mxu1 %v263_v18  ;;  %3346 = vmatprep.subr.mxu0 %v359_v25 }
  0x80   :  { %3372 = vmatpush3.msra.mxu1 %v263_v18  ;;  %3347 = vmatpush3.msra.mxu0 %v359_v25  ;;  %v877_v18 = vld [vmem:[#allocation6 + $0x88] sm:$0xff] }
  0x81   :  { %3373 = vmatprep.subr.mxu1 %v262_v20  ;;  %3348 = vmatprep.subr.mxu0 %v358_v27 }
  0x82   :  { %3374 = vmatpush3.msra.mxu1 %v262_v20  ;;  %3349 = vmatpush3.msra.mxu0 %v358_v27 }
  0x83   :  { %3375 = vmatprep.subr.mxu1 %v261_v22  ;;  %3350 = vmatprep.subr.mxu0 %v357_v32 }
  0x84   :  { %3376 = vmatpush3.msra.mxu1 %v261_v22  ;;  %3351 = vmatpush3.msra.mxu0 %v357_v32  ;;  %v799_v32 = vld [vmem:[#allocation6 + $0x78] sm:$0xff] }
  0x85   :  { %3377 = vmatprep.subr.mxu1 %v260_v24  ;;  %3352 = vmatprep.subr.mxu0 %v356_v34 }
  0x86   :  { %3378 = vmatpush3.msra.mxu1 %v260_v24  ;;  %3353 = vmatpush3.msra.mxu0 %v356_v34  ;;  %v2897_v24 = vld [vmem:[#allocation4] ss:$0 sm:$0xff]  ;;  %v797_v34 = vld [vmem:[#allocation6 + $0x68] sm:$0xff] }
  0x87   :  { %3379 = vmatprep.subr.mxu1 %v259_v26  ;;  %3354 = vmatprep.subr.mxu0 %v355_v36 }
  0x88   :  { %3380 = vmatpush3.msra.mxu1 %v259_v26  ;;  %3355 = vmatpush3.msra.mxu0 %v355_v36  ;;  %v793_v36 = vld [vmem:[#allocation6 + $0x48] sm:$0xff] }
  0x89   :  { %3381 = vmatprep.subr.mxu1 %v258_v28  ;;  %3356 = vmatprep.subr.mxu0 %v354_v37 }
  0x8a   :  { %3382 = vmatpush3.msra.mxu1 %v258_v28  ;;  %3357 = vmatpush3.msra.mxu0 %v354_v37  ;;  %v792_v37 = vld [vmem:[#allocation6 + $0x40] sm:$0xff] }
  0x8b   :  { %3383 = vmatprep.subr.mxu1 %v257_v29  ;;  %3452 = vmatprep.subr.mxu0 %v891_v60 }
  0x8c   :  { %3384 = vmatpush3.msra.mxu1 %v257_v29 }
  0x8d   :  { %3385 = vmatprep.subr.mxu1 %v256_v30 }
  0x8e   :  { %3386 = vmatpush3.msra.mxu1 %v256_v30 }
  0x8f   :  { %3387 = vmatprep.subr.mxu1 %v255_v31 }
  0x90   :  { %3388 = vmatpush3.msra.mxu1 %v255_v31 }
  0x91   :  { %3389 = vmatprep.subr.mxu1 %v254_v33 }
  0x92   :  { %3390 = vmatpush3.msra.mxu1 %v254_v33  ;;  %v798_v33 = vld [vmem:[#allocation6 + $0x70] sm:$0xff] }
  0x93   :  { %3391 = vmatprep.subr.mxu1 %v253_v35 }
  0x94   :  { %3392 = vmatpush3.msra.mxu1 %v253_v35  ;;  %v795_v35 = vld [vmem:[#allocation6 + $0x58] sm:$0xff] }
  0x95   :  { %3396 = vmatprep.subr.mxu1 %v4311_v0 }
 0x131   :  { %v3318_v38 = vpop.f32.mrf.mxu1 }
 0x133   :  { %v244_v39 = vpop.f32.mrf.mxu1 }
 0x134   :  { %3393 = vmatprep.mubr.f32.mxu1 %v244_v39  ;;  %v789_v39 = vld [vmem:[#allocation6 + $0x28] sm:$0xff] }
 0x135   :  { %v3325_v41 = vpop.f32.mrf.mxu1  ;;  %3394 = vmatmul.mubr.f32.vlgmr.msra.gmra.mxu1 %v3318_v38  ;;  %v790_v38 = vld [vmem:[#allocation6 + $0x30] sm:$0xff] }
 0x136   :  { %3397 = vmatpush3.msra.mxu1 %v4311_v0  ;;  %3400 = vmatprep.mubr.msk.f32.mxu1 %vm171_vm0, %v4343_v40  ;;  %v887_v0 = vld [vmem:[#allocation6 + $0xd8] sm:$0xff] }
 0x137   :  { %v344_v43 = vpop.f32.mrf.mxu1  ;;  %3398 = vmatprep.subr.mxu1 %v4316_v1 }
 0x138   :  { %3358 = vmatprep.mubr.f32.mxu0 %v344_v43  ;;  %3399 = vmatpush3.msra.mxu1 %v4316_v1  ;;  %v886_v1 = vld [vmem:[#allocation6 + $0xd0] sm:$0xff]  ;;  %v787_v43 = vld [vmem:[#allocation6 + $0x18] sm:$0xff] }
 0x139   :  { %3359 = vmatmul.mubr.f32.vlgmr.msra.gmra.mxu0 %v3325_v41  ;;  %3401 = vmatmul.mubr.msk.f32.vlgmr.msra.gmra.mxu1 %vm171_vm0, %v4348_v42  ;;  %v788_v41 = vld [vmem:[#allocation6 + $0x20] sm:$0xff] }
 0x13a   :  { %3403 = vmatprep.subr.mxu1 %v620_v44  ;;  %3453 = vmatpush3.msra.mxu0 %v891_v60  ;;  %v1130_v60 = vld [vmem:[#allocation6 + $0x160] sm:$0xff] }
 0x13b   :  { %3404 = vmatpush3.msra.mxu1 %v620_v44  ;;  %3454 = vmatprep.subr.mxu0 %v890_v61  ;;  %v786_v44 = vld [vmem:[#allocation6 + $0x10] sm:$0xff] }
 0x13c   :  { %3405 = vmatprep.subr.mxu1 %v619_v45  ;;  %3455 = vmatpush3.msra.mxu0 %v890_v61  ;;  %v1129_v61 = vld [vmem:[#allocation6 + $0x158] sm:$0xff] }
 0x13d   :  { %3406 = vmatpush3.msra.mxu1 %v619_v45  ;;  %3456 = vmatprep.subr.mxu0 %v889_v62  ;;  %v785_v45 = vld [vmem:[#allocation6 + $0x8] sm:$0xff] }
 0x13e   :  { %3407 = vmatprep.subr.mxu1 %v618_v46  ;;  %3457 = vmatpush3.msra.mxu0 %v889_v62  ;;  %v1402_v62 = vld [vmem:[#allocation10 + $0xd8] sm:$0xff] }
 0x13f   :  { %3408 = vmatpush3.msra.mxu1 %v618_v46  ;;  %3458 = vmatprep.subr.mxu0 %v888_v63  ;;  %v784_v46 = vld [vmem:[#allocation6] sm:$0xff] }
 0x140   :  { %3409 = vmatprep.subr.mxu1 %v617_v47  ;;  %3459 = vmatpush3.msra.mxu0 %v888_v63  ;;  %v1128_v63 = vld [vmem:[#allocation6 + $0x150] sm:$0xff] }
 0x141   :  { %3410 = vmatpush3.msra.mxu1 %v617_v47  ;;  %3460 = vmatprep.subr.mxu0 %v887_v0  ;;  %v4164_v47 = vmov 0.0  }
 0x142   :  { %3411 = vmatprep.subr.mxu1 %v616_v48  ;;  %3461 = vmatpush3.msra.mxu0 %v887_v0  ;;  %v1401_v0 = vld [vmem:[#allocation10 + $0xd0] sm:$0xff] }
 0x143   :  { %3412 = vmatpush3.msra.mxu1 %v616_v48  ;;  %3462 = vmatprep.subr.mxu0 %v886_v1 }
 0x144   :  { %3413 = vmatprep.subr.mxu1 %v615_v49  ;;  %3463 = vmatpush3.msra.mxu0 %v886_v1  ;;  %v1127_v1 = vld [vmem:[#allocation6 + $0x148] sm:$0xff] }
 0x145   :  { %3414 = vmatpush3.msra.mxu1 %v615_v49  ;;  %3464 = vmatprep.subr.mxu0 %v885_v4 }
 0x146   :  { %3415 = vmatprep.subr.mxu1 %v614_v50  ;;  %3465 = vmatpush3.msra.mxu0 %v885_v4  ;;  %v1400_v4 = vld [vmem:[#allocation10 + $0xc8] sm:$0xff] }
 0x147   :  { %3416 = vmatpush3.msra.mxu1 %v614_v50  ;;  %3466 = vmatprep.subr.mxu0 %v884_v6  ;;  %v4379_v50 = vld [vmem:[%s5021_s22] sm:$0xff] }
 0x148   :  { %3417 = vmatprep.subr.mxu1 %v613_v51  ;;  %3467 = vmatpush3.msra.mxu0 %v884_v6  ;;  %v1126_v6 = vld [vmem:[#allocation6 + $0x140] sm:$0xff] }
 0x149   :  { %3418 = vmatpush3.msra.mxu1 %v613_v51  ;;  %3468 = vmatprep.subr.mxu0 %v883_v8 }
 0x14a   :  { %3419 = vmatprep.subr.mxu1 %v612_v52  ;;  %3469 = vmatpush3.msra.mxu0 %v883_v8  ;;  %v1399_v8 = vld [vmem:[#allocation10 + $0xc0] sm:$0xff] }
 0x14b   :  { %3420 = vmatpush3.msra.mxu1 %v612_v52  ;;  %3470 = vmatprep.subr.mxu0 %v882_v9  ;;  %v4384_v52 = vld [vmem:[#allocation12] sm:$0xff] }
 0x14c   :  { %3421 = vmatprep.subr.mxu1 %v611_v53  ;;  %3471 = vmatpush3.msra.mxu0 %v882_v9  ;;  %v1125_v9 = vld [vmem:[#allocation6 + $0x138] sm:$0xff] }
 0x14d   :  { %3422 = vmatpush3.msra.mxu1 %v611_v53  ;;  %3472 = vmatprep.subr.mxu0 %v881_v10 }
 0x14e   :  { %3423 = vmatprep.subr.mxu1 %v610_v54  ;;  %3473 = vmatpush3.msra.mxu0 %v881_v10  ;;  %v1398_v10 = vld [vmem:[#allocation10 + $0xb8] sm:$0xff] }
 0x14f   :  { %3424 = vmatpush3.msra.mxu1 %v610_v54  ;;  %3474 = vmatprep.subr.mxu0 %v880_v11  ;;  %v4392_v54 = vld [vmem:[#allocation12 + $0x8] sm:$0xff] }
 0x150   :  { %3425 = vmatprep.subr.mxu1 %v609_v55  ;;  %3475 = vmatpush3.msra.mxu0 %v880_v11  ;;  %v1124_v11 = vld [vmem:[#allocation6 + $0x130] sm:$0xff] }
 0x151   :  { %3426 = vmatpush3.msra.mxu1 %v609_v55  ;;  %3476 = vmatprep.subr.mxu0 %v879_v12  ;;  %v1133_v55 = vld [vmem:[#allocation6 + $0x178] sm:$0xff] }
 0x152   :  { %3427 = vmatprep.subr.mxu1 %v608_v56  ;;  %3477 = vmatpush3.msra.mxu0 %v879_v12  ;;  %v1397_v12 = vld [vmem:[#allocation10 + $0xb0] sm:$0xff] }
 0x153   :  { %3428 = vmatpush3.msra.mxu1 %v608_v56  ;;  %3478 = vmatprep.subr.mxu0 %v878_v17  ;;  %v1406_v56 = vld [vmem:[#allocation10 + $0xf8] sm:$0xff] }
 0x154   :  { %3429 = vmatprep.subr.mxu1 %v607_v57  ;;  %3479 = vmatpush3.msra.mxu0 %v878_v17  ;;  %v1394_v17 = vld [vmem:[#allocation10 + $0x98] sm:$0xff] }
 0x155   :  { %3430 = vmatpush3.msra.mxu1 %v607_v57  ;;  %3480 = vmatprep.subr.mxu0 %v877_v18  ;;  %v1405_v57 = vld [vmem:[#allocation10 + $0xf0] sm:$0xff] }
 0x156   :  { %3431 = vmatprep.subr.mxu1 %v606_v58  ;;  %3481 = vmatpush3.msra.mxu0 %v877_v18  ;;  %v1121_v18 = vld [vmem:[#allocation6 + $0x118] sm:$0xff] }
 0x157   :  { %3432 = vmatpush3.msra.mxu1 %v606_v58  ;;  %3482 = vmatprep.subr.mxu0 %v876_v19  ;;  %v1131_v58 = vld [vmem:[#allocation6 + $0x168] sm:$0xff] }
 0x158   :  { %3433 = vmatprep.subr.mxu1 %v605_v59  ;;  %3483 = vmatpush3.msra.mxu0 %v876_v19  ;;  %v1393_v19 = vld [vmem:[#allocation10 + $0x90] sm:$0xff] }
 0x159   :  { %3434 = vmatpush3.msra.mxu1 %v605_v59  ;;  %v1404_v59 = vld [vmem:[#allocation10 + $0xe8] sm:$0xff] }
 0x1f5   :  { %v3395_v13 = vpop.f32.mrf.mxu1 }
 0x1f7   :  { %v511_v14 = vpop.f32.mrf.mxu1 }
 0x1f9   :  { %v3402_v15 = vpop.f32.mrf.mxu1  ;;  %v3360_v20 = vpop.f32.mrf.mxu0 }
 0x1fa   :  { %v517_v22 = vadd.f32 %v3395_v13, %v3360_v20  ;;  %v1123_v13 = vld [vmem:[#allocation6 + $0x128] sm:$0xff]  ;;  %v1120_v20 = vld [vmem:[#allocation6 + $0x110] sm:$0xff] }
 0x1fb   :  { %v595_v16 = vpop.f32.mrf.mxu1  ;;  %v436_v21 = vpop.f32.mrf.mxu0 }
 0x1fc   :  { %3435 = vmatprep.mubr.f32.mxu1 %v595_v16  ;;  %v512_v25 = vadd.f32 %v511_v14, %v436_v21  ;;  %v1396_v14 = vld [vmem:[#allocation10 + $0xa8] sm:$0xff] }
 0x1fd   :  { %3436 = vmatmul.mubr.f32.vlgmr.msra.gmra.mxu1 %v3402_v15  ;;  %v1395_v15 = vld [vmem:[#allocation10 + $0xa0] sm:$0xff]  ;;  %v1122_v16 = vld [vmem:[#allocation6 + $0x120] sm:$0xff] }
 0x1fe   :  { %3442 = vmatprep.mubr.msk.f32.mxu1 %vm171_vm0, %v4318_v2  ;;  %v1392_v21 = vld [vmem:[#allocation10 + $0x88] sm:$0xff] }
 0x2bd   :  { %v3437_v23 = vpop.f32.mrf.mxu1 }
 0x2be   :  { %v697_v26 = vadd.f32 %v3437_v23, %v517_v22  ;;  %v1119_v22 = vld [vmem:[#allocation6 + $0x108] sm:$0xff]  ;;  %v1391_v23 = vld [vmem:[#allocation10 + $0x80] sm:$0xff] }
 0x2bf   :  { %v687_v27 = vpop.f32.mrf.mxu1 }
 0x2c0   :  { %v706_v28 = vadd.f32 %v2897_v24, %v697_v26  ;;  %v696_v29 = vadd.f32 %v687_v27, %v512_v25 }
 0x2c2   :  { %v4356_v2 = vmax.f32 %v706_v28, 0.0  ;;  %v705_v30 = vadd.f32 %v2897_v24, %v696_v29  ;;  %v1118_v24 = vld [vmem:[#allocation6 + $0x100] sm:$0xff] }
 0x2c4   :  { %v4358_v31 = vmax.f32 %v705_v30, 0.0  ;;  %3438 = vmatprep.subr.mxu1 %v4356_v2  ;;  %3522 = vmatprep.subr.mxu0 %v4356_v2 }
 0x2c5   :  { %3439 = vmatpush3.msra.mxu1 %v4356_v2 }
 0x2c6   :  { %3440 = vmatprep.subr.mxu1 %v4358_v31 }
 0x2c7   :  { %3441 = vmatpush3.msra.mxu1 %v4358_v31 }
 0x2c8   :  { %3443 = vmatmul.mubr.msk.f32.vlgmr.msra.gmra.mxu1 %vm171_vm0, %v4324_v3  ;;  %3445 = vmatprep.subr.mxu1 %v4356_v2  ;;  %v796_v3 = vld [vmem:[#allocation6 + $0x60] sm:$0xff] }
 0x2c9   :  { %3446 = vmatpush3.msra.mxu1 %v4356_v2  ;;  %3449 = vmatprep.mubr.msk.f32.mxu1 %vm171_vm0, %v4327_v5  ;;  %v794_v5 = vld [vmem:[#allocation6 + $0x50] sm:$0xff] }
 0x2ca   :  { %3447 = vmatprep.subr.mxu1 %v4358_v31 }
 0x2cb   :  { %3448 = vmatpush3.msra.mxu1 %v4358_v31 }
 0x2cc   :  { %3450 = vmatmul.mubr.msk.f32.vlgmr.msra.gmra.mxu1 %vm171_vm0, %v4336_v7  ;;  %3487 = vmatprep.subr.mxu1 %v799_v32  ;;  %v791_v7 = vld [vmem:[#allocation6 + $0x38] sm:$0xff] }
 0x2cd   :  { %3488 = vmatpush3.msra.mxu1 %v799_v32 }
 0x2ce   :  { %3489 = vmatprep.subr.mxu1 %v798_v33 }
 0x2cf   :  { %3490 = vmatpush3.msra.mxu1 %v798_v33 }
 0x2d0   :  { %3491 = vmatprep.subr.mxu1 %v797_v34 }
 0x2d1   :  { %3492 = vmatpush3.msra.mxu1 %v797_v34 }
 0x2d2   :  { %3493 = vmatprep.subr.mxu1 %v796_v3 }
 0x2d3   :  { %3494 = vmatpush3.msra.mxu1 %v796_v3 }
 0x2d4   :  { %3495 = vmatprep.subr.mxu1 %v795_v35 }
 0x2d5   :  { %3496 = vmatpush3.msra.mxu1 %v795_v35  ;;  %v1314_v35 = vld [vmem:[#allocation10 + $0x78] sm:$0xff] }
 0x2d6   :  { %3497 = vmatprep.subr.mxu1 %v794_v5 }
 0x2d7   :  { %3498 = vmatpush3.msra.mxu1 %v794_v5  ;;  %v4432_v5 = vld [vmem:[#allocation12 + $0x10] sm:$0xff] }
 0x2d8   :  { %3499 = vmatprep.subr.mxu1 %v793_v36 }
 0x2d9   :  { %3500 = vmatpush3.msra.mxu1 %v793_v36  ;;  %v1313_v36 = vld [vmem:[#allocation10 + $0x70] sm:$0xff] }
 0x2da   :  { %3501 = vmatprep.subr.mxu1 %v792_v37 }
 0x2db   :  { %3502 = vmatpush3.msra.mxu1 %v792_v37  ;;  %v1638_v37 = vld [vmem:[#allocation10 + $0x178] sm:$0xff] }
 0x2dc   :  { %3503 = vmatprep.subr.mxu1 %v791_v7 }
 0x2dd   :  { %3504 = vmatpush3.msra.mxu1 %v791_v7  ;;  %v1312_v7 = vld [vmem:[#allocation10 + $0x68] sm:$0xff] }
 0x2de   :  { %3505 = vmatprep.subr.mxu1 %v790_v38 }
 0x2df   :  { %3506 = vmatpush3.msra.mxu1 %v790_v38  ;;  %v1637_v38 = vld [vmem:[#allocation10 + $0x170] sm:$0xff] }
 0x2e0   :  { %3507 = vmatprep.subr.mxu1 %v789_v39 }
 0x2e1   :  { %3508 = vmatpush3.msra.mxu1 %v789_v39  ;;  %v1311_v39 = vld [vmem:[#allocation10 + $0x60] sm:$0xff] }
 0x2e2   :  { %3509 = vmatprep.subr.mxu1 %v788_v41 }
 0x2e3   :  { %3510 = vmatpush3.msra.mxu1 %v788_v41  ;;  %v1636_v41 = vld [vmem:[#allocation10 + $0x168] sm:$0xff] }
 0x2e4   :  { %3511 = vmatprep.subr.mxu1 %v787_v43 }
 0x2e5   :  { %3512 = vmatpush3.msra.mxu1 %v787_v43  ;;  %v1310_v43 = vld [vmem:[#allocation10 + $0x58] sm:$0xff] }
 0x2e6   :  { %3513 = vmatprep.subr.mxu1 %v786_v44 }
 0x2e7   :  { %3514 = vmatpush3.msra.mxu1 %v786_v44  ;;  %v1635_v44 = vld [vmem:[#allocation10 + $0x160] sm:$0xff] }
 0x2e8   :  { %3515 = vmatprep.subr.mxu1 %v785_v45 }
 0x2e9   :  { %3516 = vmatpush3.msra.mxu1 %v785_v45  ;;  %v1309_v45 = vld [vmem:[#allocation10 + $0x50] sm:$0xff] }
 0x2ea   :  { %3517 = vmatprep.subr.mxu1 %v784_v46 }
 0x2eb   :  { %3518 = vmatpush3.msra.mxu1 %v784_v46  ;;  %v1634_v46 = vld [vmem:[#allocation10 + $0x158] sm:$0xff] }
 0x2ec   :  { %3564 = vmatprep.subr.mxu1 %v4164_v47 }
 0x388   :  { %v3444_v48 = vpop.f32.mrf.mxu1 }
 0x38a   :  { %v775_v49 = vpop.f32.mrf.mxu1 }
 0x38b   :  { %3519 = vmatprep.mubr.f32.mxu1 %v775_v49  ;;  %v1633_v49 = vld [vmem:[#allocation10 + $0x150] sm:$0xff] }
 0x38c   :  { %v3451_v51 = vpop.f32.mrf.mxu1  ;;  %3520 = vmatmul.mubr.f32.vlgmr.msra.gmra.mxu1 %v3444_v48  ;;  %v1308_v48 = vld [vmem:[#allocation10 + $0x48] sm:$0xff] }
 0x38d   :  { %3565 = vmatpush3.msra.mxu1 %v4379_v50  ;;  %3566 = vmatprep.mubr.msk.f32.mxu1 %vm4165_vm1, %v4164_v47 }
 0x38e   :  { %v866_v53 = vpop.f32.mrf.mxu1  ;;  %3569 = vmatprep.subr.mxu1 %v4164_v47 }
 0x38f   :  { %3484 = vmatprep.mubr.f32.mxu0 %v866_v53  ;;  %v1632_v53 = vld [vmem:[#allocation10 + $0x148] sm:$0xff] }
 0x390   :  { %3485 = vmatmul.mubr.f32.vlgmr.msra.gmra.mxu0 %v3451_v51  ;;  %3567 = vmatmul.mubr.msk.f32.vlgmr.msra.gmra.mxu1 %vm1225_vm2, %v4384_v52  ;;  %v1307_v51 = vld [vmem:[#allocation10 + $0x40] sm:$0xff] }
 0x391   :  { %3523 = vmatpush3.msra.mxu0 %v4356_v2  ;;  %3526 = vmatprep.mubr.msk.f32.mxu0 %vm171_vm0, %v4343_v40  ;;  %v1132_v40 = vld [vmem:[#allocation6 + $0x170] sm:$0xff] }
 0x392   :  { %3524 = vmatprep.subr.mxu0 %v4358_v31  ;;  %3570 = vmatpush3.msra.mxu1 %v4379_v50 }
 0x393   :  { %3525 = vmatpush3.msra.mxu0 %v4358_v31  ;;  %3571 = vmatprep.mubr.msk.f32.mxu1 %vm4165_vm1, %v4164_v47 }
 0x394   :  { %3527 = vmatmul.mubr.msk.f32.vlgmr.msra.gmra.mxu0 %vm171_vm0, %v4348_v42  ;;  %3572 = vmatmul.mubr.msk.f32.vlgmr.msra.gmra.mxu1 %vm1225_vm2, %v4392_v54  ;;  %v1403_v42 = vld [vmem:[#allocation10 + $0xe0] sm:$0xff] }
 0x395   :  { %3574 = vmatprep.subr.mxu1 %v4164_v47  ;;  %3529 = vmatprep.subr.mxu0 %v1133_v55 }
 0x396   :  { %3575 = vmatpush3.msra.mxu1 %v1406_v56  ;;  %3530 = vmatpush3.msra.mxu0 %v1133_v55  ;;  %v1306_v55 = vld [vmem:[#allocation10 + $0x38] sm:$0xff]  ;;  %v1631_v56 = vld [vmem:[#allocation10 + $0x140] sm:$0xff] }
 0x397   :  { %3576 = vmatprep.subr.mxu1 %v4164_v47  ;;  %3531 = vmatprep.subr.mxu0 %v1132_v40 }
 0x398   :  { %3577 = vmatpush3.msra.mxu1 %v1405_v57  ;;  %3532 = vmatpush3.msra.mxu0 %v1132_v40  ;;  %v1305_v40 = vld [vmem:[#allocation10 + $0x30] sm:$0xff]  ;;  %v1630_v57 = vld [vmem:[#allocation10 + $0x138] sm:$0xff] }
 0x399   :  { %3578 = vmatprep.subr.mxu1 %v4164_v47  ;;  %3533 = vmatprep.subr.mxu0 %v1131_v58 }
 0x39a   :  { %3579 = vmatpush3.msra.mxu1 %v1404_v59  ;;  %3534 = vmatpush3.msra.mxu0 %v1131_v58  ;;  %v1304_v58 = vld [vmem:[#allocation10 + $0x28] sm:$0xff]  ;;  %v1629_v59 = vld [vmem:[#allocation10 + $0x130] sm:$0xff] }
 0x39b   :  { %3580 = vmatprep.subr.mxu1 %v4164_v47  ;;  %3535 = vmatprep.subr.mxu0 %v1130_v60 }
 0x39c   :  { %3581 = vmatpush3.msra.mxu1 %v1403_v42  ;;  %3536 = vmatpush3.msra.mxu0 %v1130_v60  ;;  %v1303_v60 = vld [vmem:[#allocation10 + $0x20] sm:$0xff]  ;;  %v1628_v42 = vld [vmem:[#allocation10 + $0x128] sm:$0xff] }
 0x39d   :  { %3582 = vmatprep.subr.mxu1 %v4164_v47  ;;  %3537 = vmatprep.subr.mxu0 %v1129_v61 }
 0x39e   :  { %3583 = vmatpush3.msra.mxu1 %v1402_v62  ;;  %3538 = vmatpush3.msra.mxu0 %v1129_v61  ;;  %v1302_v61 = vld [vmem:[#allocation10 + $0x18] sm:$0xff]  ;;  %v1627_v62 = vld [vmem:[#allocation10 + $0x120] sm:$0xff] }
 0x39f   :  { %3584 = vmatprep.subr.mxu1 %v4164_v47  ;;  %3539 = vmatprep.subr.mxu0 %v1128_v63 }
 0x3a0   :  { %3585 = vmatpush3.msra.mxu1 %v1401_v0  ;;  %3540 = vmatpush3.msra.mxu0 %v1128_v63  ;;  %v1301_v63 = vld [vmem:[#allocation10 + $0x10] sm:$0xff]  ;;  %v1626_v0 = vld [vmem:[#allocation10 + $0x118] sm:$0xff] }
 0x3a1   :  { %3586 = vmatprep.subr.mxu1 %v4164_v47  ;;  %3541 = vmatprep.subr.mxu0 %v1127_v1 }
 0x3a2   :  { %3587 = vmatpush3.msra.mxu1 %v1400_v4  ;;  %3542 = vmatpush3.msra.mxu0 %v1127_v1  ;;  %v1300_v1 = vld [vmem:[#allocation10 + $0x8] sm:$0xff]  ;;  %v1299_v4 = vld [vmem:[#allocation10] sm:$0xff] }
 0x3a3   :  { %3588 = vmatprep.subr.mxu1 %v4164_v47  ;;  %3543 = vmatprep.subr.mxu0 %v1126_v6 }
 0x3a4   :  { %3589 = vmatpush3.msra.mxu1 %v1399_v8  ;;  %3544 = vmatpush3.msra.mxu0 %v1126_v6  ;;  %v1625_v6 = vld [vmem:[#allocation10 + $0x110] sm:$0xff]  ;;  %v1624_v8 = vld [vmem:[#allocation10 + $0x108] sm:$0xff] }
 0x3a5   :  { %3590 = vmatprep.subr.mxu1 %v4164_v47  ;;  %3545 = vmatprep.subr.mxu0 %v1125_v9 }
 0x3a6   :  { %3591 = vmatpush3.msra.mxu1 %v1398_v10  ;;  %3546 = vmatpush3.msra.mxu0 %v1125_v9  ;;  %v1623_v9 = vld [vmem:[#allocation10 + $0x100] sm:$0xff] }
 0x3a7   :  { %3592 = vmatprep.subr.mxu1 %v4164_v47  ;;  %3547 = vmatprep.subr.mxu0 %v1124_v11 }
 0x3a8   :  { %3593 = vmatpush3.msra.mxu1 %v1397_v12  ;;  %3548 = vmatpush3.msra.mxu0 %v1124_v11 }
 0x3a9   :  { %3594 = vmatprep.subr.mxu1 %v4164_v47  ;;  %3549 = vmatprep.subr.mxu0 %v1123_v13 }
 0x3aa   :  { %3595 = vmatpush3.msra.mxu1 %v1396_v14  ;;  %3550 = vmatpush3.msra.mxu0 %v1123_v13 }
 0x3ab   :  { %3596 = vmatprep.subr.mxu1 %v4164_v47  ;;  %3606 = vmatprep.mubr.msk.f32.mxu1 %vm4165_vm1, %v4164_v47 }
 0x3ac   :  { %3597 = vmatpush3.msra.mxu1 %v1395_v15  ;;  %3551 = vmatprep.subr.mxu0 %v1122_v16 }
 0x3ad   :  { %3598 = vmatprep.subr.mxu1 %v4164_v47  ;;  %3552 = vmatpush3.msra.mxu0 %v1122_v16 }
 0x3ae   :  { %3599 = vmatpush3.msra.mxu1 %v1394_v17  ;;  %3553 = vmatprep.subr.mxu0 %v1121_v18 }
 0x3af   :  { %3600 = vmatprep.subr.mxu1 %v4164_v47  ;;  %3554 = vmatpush3.msra.mxu0 %v1121_v18 }
 0x3b0   :  { %3601 = vmatpush3.msra.mxu1 %v1393_v19  ;;  %3555 = vmatprep.subr.mxu0 %v1120_v20 }
 0x3b1   :  { %3602 = vmatprep.subr.mxu1 %v4164_v47  ;;  %3556 = vmatpush3.msra.mxu0 %v1120_v20 }
 0x3b2   :  { %3603 = vmatpush3.msra.mxu1 %v1392_v21  ;;  %3557 = vmatprep.subr.mxu0 %v1119_v22  ;;  %v1804_v21 = vld [vmem:[%s5002_s9 + $0x78] sm:$0xff] }
 0x3b3   :  { %3604 = vmatprep.subr.mxu1 %v4164_v47  ;;  %3558 = vmatpush3.msra.mxu0 %v1119_v22  ;;  %v1803_v22 = vld [vmem:[%s5002_s9 + $0x70] sm:$0xff] }
 0x3b4   :  { %3605 = vmatpush3.msra.mxu1 %v1391_v23  ;;  %3559 = vmatprep.subr.mxu0 %v1118_v24  ;;  %v1802_v23 = vld [vmem:[%s5002_s9 + $0x68] sm:$0xff] }
 0x3b5   :  { %3644 = vmatprep.subr.mxu1 %v4164_v47  ;;  %3560 = vmatpush3.msra.mxu0 %v1118_v24  ;;  %v1801_v24 = vld [vmem:[%s5002_s9 + $0x60] sm:$0xff] }
 0x3b6   :  { %3609 = vmatprep.subr.mxu0 %v4164_v47 }
 0x44c   :  { %v3521_v25 = vpop.f32.mrf.mxu1 }
 0x44e   :  { %v1033_v26 = vpop.f32.mrf.mxu1 }
 0x450   :  { %v3486_v27 = vpop.f32.mrf.mxu0  ;;  %v4423_v28 = vpop.f32.mrf.mxu1 }
 0x451   :  { %v4425_v29 = vadd.f32 %v3521_v25, %v3486_v27  ;;  %v1800_v25 = vld [vmem:[%s5002_s9 + $0x58] sm:$0xff]  ;;  %v1798_v27 = vld [vmem:[%s5002_s9 + $0x48] sm:$0xff] }
 0x452   :  { %v958_v2 = vpop.f32.mrf.mxu0  ;;  %v3568_v30 = vpop.f32.mrf.mxu1 }
 0x453   :  { %v4427_v31 = vadd.f32 %v1033_v26, %v958_v2  ;;  %v1799_v26 = vld [vmem:[%s5002_s9 + $0x50] sm:$0xff]  ;;  %v1794_v30 = vld [vmem:[%s5002_s9 + $0x28] sm:$0xff] }
 0x454   :  { %v3528_v32 = vpop.f32.mrf.mxu0  ;;  %v1386_v33 = vpop.f32.mrf.mxu1  ;;  %v1795_v2 = vld [vmem:[%s5002_s9 + $0x30] sm:$0xff] }
 0x455   :  { %3607 = vmatmul.mubr.f32.vlgmr.msra.gmra.mxu1 %v1386_v33  ;;  %v1791_v33 = vld [vmem:[%s5002_s9 + $0x10] sm:$0xff] }
 0x456   :  { %v1108_v34 = vpop.f32.mrf.mxu0  ;;  %v3573_v3 = vpop.f32.mrf.mxu1  ;;  %3645 = vmatpush3.msra.mxu1 %v4379_v50  ;;  %3646 = vmatprep.mubr.msk.f32.mxu1 %vm4165_vm1, %v4164_v47 }
 0x457   :  { %3561 = vmatprep.mubr.f32.mxu0 %v1108_v34  ;;  %3649 = vmatprep.subr.mxu1 %v4164_v47  ;;  %v1790_v34 = vld [vmem:[%s5002_s9 + $0x8] sm:$0xff] }
 0x458   :  { %3562 = vmatmul.mubr.f32.vlgmr.msra.gmra.mxu0 %v3528_v32  ;;  %v1792_v32 = vld [vmem:[%s5002_s9 + $0x18] sm:$0xff] }
 0x459   :  { %3610 = vmatpush3.msra.mxu0 %v1314_v35  ;;  %3647 = vmatmul.mubr.msk.f32.vlgmr.msra.gmra.mxu1 %vm1225_vm2, %v4432_v5  ;;  %v2908_v35 = vld [vmem:[%s5001_s8] ss:$0 sm:$0xff] }
 0x45a   :  { %3611 = vmatprep.subr.mxu0 %v4164_v47  ;;  %3641 = vmatprep.mubr.msk.f32.mxu0 %vm4165_vm1, %v4164_v47 }
 0x45b   :  { %3612 = vmatpush3.msra.mxu0 %v1313_v36  ;;  %3650 = vmatpush3.msra.mxu1 %v1638_v37 }
 0x45c   :  { %3613 = vmatprep.subr.mxu0 %v4164_v47  ;;  %3651 = vmatprep.subr.mxu1 %v4164_v47 }
 0x45d   :  { %3614 = vmatpush3.msra.mxu0 %v1312_v7  ;;  %3652 = vmatpush3.msra.mxu1 %v1637_v38 }
 0x45e   :  { %3615 = vmatprep.subr.mxu0 %v4164_v47  ;;  %3653 = vmatprep.subr.mxu1 %v4164_v47 }
 0x45f   :  { %3616 = vmatpush3.msra.mxu0 %v1311_v39  ;;  %3654 = vmatpush3.msra.mxu1 %v1636_v41  ;;  %v2926_v39 = vld [vmem:[%s5002_s9 + $0xf8] sm:$0xff]  ;;  %v2924_v41 = vld [vmem:[%s5002_s9 + $0xe8] sm:$0xff] }
 0x460   :  { %3617 = vmatprep.subr.mxu0 %v4164_v47  ;;  %3655 = vmatprep.subr.mxu1 %v4164_v47 }
 0x461   :  { %3618 = vmatpush3.msra.mxu0 %v1310_v43  ;;  %3656 = vmatpush3.msra.mxu1 %v1635_v44  ;;  %v2922_v43 = vld [vmem:[%s5002_s9 + $0xd8] sm:$0xff]  ;;  %v2921_v44 = vld [vmem:[%s5002_s9 + $0xd0] sm:$0xff] }
 0x462   :  { %3619 = vmatprep.subr.mxu0 %v4164_v47  ;;  %3657 = vmatprep.subr.mxu1 %v4164_v47 }
 0x463   :  { %3620 = vmatpush3.msra.mxu0 %v1309_v45  ;;  %3658 = vmatpush3.msra.mxu1 %v1634_v46  ;;  %v2920_v45 = vld [vmem:[%s5002_s9 + $0xc8] sm:$0xff]  ;;  %v2919_v46 = vld [vmem:[%s5002_s9 + $0xc0] sm:$0xff] }
 0x464   :  { %3621 = vmatprep.subr.mxu0 %v4164_v47  ;;  %3659 = vmatprep.subr.mxu1 %v4164_v47 }
 0x465   :  { %3622 = vmatpush3.msra.mxu0 %v1308_v48  ;;  %3660 = vmatpush3.msra.mxu1 %v1633_v49  ;;  %v2918_v48 = vld [vmem:[%s5002_s9 + $0xb8] sm:$0xff]  ;;  %v2917_v49 = vld [vmem:[%s5002_s9 + $0xb0] sm:$0xff] }
 0x466   :  { %3623 = vmatprep.subr.mxu0 %v4164_v47  ;;  %3661 = vmatprep.subr.mxu1 %v4164_v47 }
 0x467   :  { %3624 = vmatpush3.msra.mxu0 %v1307_v51  ;;  %3662 = vmatpush3.msra.mxu1 %v1632_v53  ;;  %v2916_v51 = vld [vmem:[%s5002_s9 + $0xa8] sm:$0xff]  ;;  %v2915_v53 = vld [vmem:[%s5002_s9 + $0xa0] sm:$0xff] }
 0x468   :  { %3625 = vmatprep.subr.mxu0 %v4164_v47  ;;  %3663 = vmatprep.subr.mxu1 %v4164_v47 }
 0x469   :  { %3626 = vmatpush3.msra.mxu0 %v1306_v55  ;;  %3664 = vmatpush3.msra.mxu1 %v1631_v56  ;;  %v2914_v55 = vld [vmem:[%s5002_s9 + $0x98] sm:$0xff]  ;;  %v2913_v56 = vld [vmem:[%s5002_s9 + $0x90] sm:$0xff] }
 0x46a   :  { %3627 = vmatprep.subr.mxu0 %v4164_v47  ;;  %3665 = vmatprep.subr.mxu1 %v4164_v47 }
 0x46b   :  { %3628 = vmatpush3.msra.mxu0 %v1305_v40  ;;  %3666 = vmatpush3.msra.mxu1 %v1630_v57  ;;  %v1789_v40 = vld [vmem:[%s5002_s9] sm:$0xff]  ;;  %v2912_v57 = vld [vmem:[%s5002_s9 + $0x88] sm:$0xff] }
 0x46c   :  { %3629 = vmatprep.subr.mxu0 %v4164_v47  ;;  %3667 = vmatprep.subr.mxu1 %v4164_v47 }
 0x46d   :  { %3630 = vmatpush3.msra.mxu0 %v1304_v58  ;;  %3668 = vmatpush3.msra.mxu1 %v1629_v59  ;;  %v2911_v58 = vld [vmem:[%s5002_s9 + $0x80] sm:$0xff] }
 0x46e   :  { %3631 = vmatprep.subr.mxu0 %v4164_v47  ;;  %3669 = vmatprep.subr.mxu1 %v4164_v47 }
 0x46f   :  { %3632 = vmatpush3.msra.mxu0 %v1303_v60  ;;  %3670 = vmatpush3.msra.mxu1 %v1628_v42 }
 0x470   :  { %3633 = vmatprep.subr.mxu0 %v4164_v47  ;;  %3671 = vmatprep.subr.mxu1 %v4164_v47 }
 0x471   :  { %3634 = vmatpush3.msra.mxu0 %v1302_v61  ;;  %3672 = vmatpush3.msra.mxu1 %v1627_v62  ;;  %v2943_v62 = vld [vmem:[%s5002_s9 + $0x178] sm:$0xff] }
 0x472   :  { %3635 = vmatprep.subr.mxu0 %v4164_v47  ;;  %3673 = vmatprep.subr.mxu1 %v4164_v47 }
 0x473   :  { %3636 = vmatpush3.msra.mxu0 %v1301_v63  ;;  %3674 = vmatpush3.msra.mxu1 %v1626_v0  ;;  %v2942_v63 = vld [vmem:[%s5002_s9 + $0x170] sm:$0xff]  ;;  %v2941_v0 = vld [vmem:[%s5002_s9 + $0x168] sm:$0xff] }
 0x474   :  { %3637 = vmatprep.subr.mxu0 %v4164_v47  ;;  %3675 = vmatprep.subr.mxu1 %v4164_v47 }
 0x475   :  { %3638 = vmatpush3.msra.mxu0 %v1300_v1  ;;  %3681 = vmatprep.mubr.msk.f32.mxu1 %vm4165_vm1, %v4164_v47  ;;  %v2939_v1 = vld [vmem:[%s5002_s9 + $0x158] sm:$0xff] }
 0x476   :  { %3639 = vmatprep.subr.mxu0 %v4164_v47  ;;  %3676 = vmatpush3.msra.mxu1 %v1625_v6  ;;  %v2937_v6 = vld [vmem:[%s5002_s9 + $0x148] sm:$0xff] }
 0x477   :  { %3640 = vmatpush3.msra.mxu0 %v1299_v4  ;;  %3677 = vmatprep.subr.mxu1 %v4164_v47  ;;  %v2938_v4 = vld [vmem:[%s5002_s9 + $0x150] sm:$0xff] }
 0x478   :  { %3642 = vmatmul.mubr.f32.vlgmr.msra.gmra.mxu0 %v4423_v28  ;;  %3684 = vmatprep.subr.mxu0 %v4164_v47  ;;  %v1797_v28 = vld [vmem:[%s5002_s9 + $0x40] sm:$0xff] }
 0x479   :  { %3686 = vmatprep.mubr.msk.f32.mxu0 %vm4165_vm1, %v4164_v47  ;;  %3678 = vmatpush3.msra.mxu1 %v1624_v8  ;;  %v2936_v8 = vld [vmem:[%s5002_s9 + $0x140] sm:$0xff] }
 0x47a   :  { %3679 = vmatprep.subr.mxu1 %v4164_v47 }
 0x47b   :  { %3680 = vmatpush3.msra.mxu1 %v1623_v9  ;;  %v2935_v9 = vld [vmem:[%s5002_s9 + $0x138] sm:$0xff] }
 0x47c   :  { %3729 = vmatprep.subr.mxu1 %v4164_v47 }
 0x515   :  { %v1473_v10 = vpop.f32.mrf.mxu1 }
 0x517   :  { %v3608_v11 = vpop.f32.mrf.mxu1 }
 0x518   :  { %v3563_v12 = vpop.f32.mrf.mxu0  ;;  %v2933_v11 = vld [vmem:[%s5002_s9 + $0x128] sm:$0xff] }
 0x519   :  { %v4477_v13 = vadd.f32 %v3563_v12, %v4425_v29  ;;  %v1618_v14 = vpop.f32.mrf.mxu1  ;;  %v1796_v29 = vld [vmem:[%s5002_s9 + $0x38] sm:$0xff]  ;;  %v2932_v12 = vld [vmem:[%s5002_s9 + $0x120] sm:$0xff] }
 0x51a   :  { %v1200_v15 = vpop.f32.mrf.mxu0  ;;  %3682 = vmatmul.mubr.f32.vlgmr.msra.gmra.mxu1 %v1618_v14  ;;  %v2931_v14 = vld [vmem:[%s5002_s9 + $0x118] sm:$0xff] }
 0x51b   :  { %v4480_v16 = vadd.f32 %v1200_v15, %v4427_v31  ;;  %v3648_v17 = vpop.f32.mrf.mxu1  ;;  %3761 = vmatprep.mubr.msk.f32.mxu1 %vm4165_vm1, %v4164_v47  ;;  %3730 = vmatpush3.msra.mxu1 %v1804_v21  ;;  %v1793_v31 = vld [vmem:[%s5002_s9 + $0x20] sm:$0xff]  ;;  %v2930_v15 = vld [vmem:[%s5002_s9 + $0x110] sm:$0xff] }
 0x51c   :  { %3731 = vmatprep.subr.mxu1 %v4164_v47  ;;  %v2929_v17 = vld [vmem:[%s5002_s9 + $0x108] sm:$0xff]  ;;  %v2215_v21 = vld [vmem:[#allocation13 + $0x68] sm:$0xff] }
 0x51d   :  { %3732 = vmatpush3.msra.mxu1 %v1803_v22  ;;  %v2214_v22 = vld [vmem:[#allocation13 + $0x60] sm:$0xff] }
 0x51e   :  { %3733 = vmatprep.subr.mxu1 %v4164_v47 }
 0x51f   :  { %3734 = vmatpush3.msra.mxu1 %v1802_v23  ;;  %v2213_v23 = vld [vmem:[#allocation13 + $0x58] sm:$0xff] }
 0x520   :  { %3735 = vmatprep.subr.mxu1 %v4164_v47 }
 0x521   :  { %3736 = vmatpush3.msra.mxu1 %v1801_v24  ;;  %v2212_v24 = vld [vmem:[#allocation13 + $0x50] sm:$0xff] }
 0x522   :  { %3737 = vmatprep.subr.mxu1 %v4164_v47 }
 0x523   :  { %3738 = vmatpush3.msra.mxu1 %v1800_v25  ;;  %v2211_v25 = vld [vmem:[#allocation13 + $0x48] sm:$0xff] }
 0x524   :  { %3739 = vmatprep.subr.mxu1 %v4164_v47 }
 0x525   :  { %3740 = vmatpush3.msra.mxu1 %v1799_v26  ;;  %v2210_v26 = vld [vmem:[#allocation13 + $0x40] sm:$0xff] }
 0x526   :  { %3741 = vmatprep.subr.mxu1 %v4164_v47 }
 0x527   :  { %3742 = vmatpush3.msra.mxu1 %v1798_v27  ;;  %v2209_v27 = vld [vmem:[#allocation13 + $0x38] sm:$0xff] }
 0x528   :  { %3743 = vmatprep.subr.mxu1 %v4164_v47 }
 0x529   :  { %3744 = vmatpush3.msra.mxu1 %v1797_v28  ;;  %v2208_v28 = vld [vmem:[#allocation13 + $0x30] sm:$0xff] }
 0x52a   :  { %3745 = vmatprep.subr.mxu1 %v4164_v47 }
 0x52b   :  { %3746 = vmatpush3.msra.mxu1 %v1796_v29  ;;  %v2207_v29 = vld [vmem:[#allocation13 + $0x28] sm:$0xff] }
 0x52c   :  { %3747 = vmatprep.subr.mxu1 %v4164_v47 }
 0x52d   :  { %3748 = vmatpush3.msra.mxu1 %v1795_v2 }
 0x52e   :  { %3749 = vmatprep.subr.mxu1 %v4164_v47 }
 0x52f   :  { %3750 = vmatpush3.msra.mxu1 %v1794_v30 }
 0x530   :  { %3751 = vmatprep.subr.mxu1 %v4164_v47 }
 0x531   :  { %3752 = vmatpush3.msra.mxu1 %v1793_v31 }
 0x532   :  { %3753 = vmatprep.subr.mxu1 %v4164_v47 }
 0x533   :  { %3754 = vmatpush3.msra.mxu1 %v1792_v32 }
 0x534   :  { %3755 = vmatprep.subr.mxu1 %v4164_v47 }
 0x535   :  { %3756 = vmatpush3.msra.mxu1 %v1791_v33 }
 0x536   :  { %3757 = vmatprep.subr.mxu1 %v4164_v47 }
 0x537   :  { %3758 = vmatpush3.msra.mxu1 %v1790_v34 }
 0x538   :  { %v1543_v18 = vpop.f32.mrf.mxu0  ;;  %3759 = vmatprep.subr.mxu1 %v4164_v47 }
 0x539   :  { %v1544_v19 = vadd.f32 %v1543_v18, %v1473_v10  ;;  %3760 = vmatpush3.msra.mxu1 %v1789_v40  ;;  %v2934_v10 = vld [vmem:[%s5002_s9 + $0x130] sm:$0xff]  ;;  %v2928_v18 = vld [vmem:[%s5002_s9 + $0x100] sm:$0xff] }
 0x53a   :  { %v3643_v20 = vpop.f32.mrf.mxu0  ;;  %3804 = vmatprep.subr.mxu1 %v4164_v47  ;;  %v2464_v40 = vld [vmem:[%s5008_s15 + $0x40] sm:$0xff] }
 0x53b   :  { %v2216_v20 = vld [vmem:[#allocation13 + $0x70] sm:$0xff] }
 0x5da   :  { %v1705_v3 = vpop.f32.mrf.mxu1 }
 0x5db   :  { %v1709_v36 = vadd.f32 %v1705_v3, %v1544_v19  ;;  %v2217_v19 = vld [vmem:[#allocation13 + $0x78] sm:$0xff] }
 0x5dc   :  { %v3683_v37 = vpop.f32.mrf.mxu1 }
 0x5dd   :  { %v1717_v7 = vadd.f32 %v2908_v35, %v1709_v36  ;;  %v2206_v35 = vld [vmem:[#allocation13 + $0x20] sm:$0xff]  ;;  %v2205_v36 = vld [vmem:[#allocation13 + $0x18] sm:$0xff]  ;;  %v2204_v37 = vld [vmem:[#allocation13 + $0x10] sm:$0xff] }
 0x5df   :  { %v4547_v38 = vmax.f32 %v1717_v7, 0.0  ;;  %v2203_v7 = vld [vmem:[#allocation13 + $0x8] sm:$0xff] }
 0x5e1   :  { %3685 = vmatpush3.msra.mxu0 %v4547_v38 }
 0x5e2   :  { %3687 = vmatmul.mubr.msk.f32.vlgmr.msra.gmra.mxu0 %vm1225_vm2, %v4384_v52  ;;  %3689 = vmatprep.subr.mxu0 %v4164_v47  ;;  %v2925_v52 = vld [vmem:[%s5002_s9 + $0xf0] sm:$0xff] }
 0x5e3   :  { %3690 = vmatpush3.msra.mxu0 %v4547_v38  ;;  %3691 = vmatprep.mubr.msk.f32.mxu0 %vm4165_vm1, %v4164_v47 }
 0x5e4   :  { %3694 = vmatprep.subr.mxu0 %v4164_v47 }
 0x5e6   :  { %3692 = vmatmul.mubr.msk.f32.vlgmr.msra.gmra.mxu0 %vm1225_vm2, %v4392_v54  ;;  %v2923_v54 = vld [vmem:[%s5002_s9 + $0xe0] sm:$0xff] }
 0x5e7   :  { %3695 = vmatpush3.msra.mxu0 %v2926_v39  ;;  %3726 = vmatprep.mubr.msk.f32.mxu0 %vm4165_vm1, %v4164_v47 }
 0x5e8   :  { %3696 = vmatprep.subr.mxu0 %v4164_v47 }
 0x5e9   :  { %3697 = vmatpush3.msra.mxu0 %v2925_v52  ;;  %v2944_v52 = vld [vmem:[%s5003_s10] ss:$0 sm:$0xff] }
 0x5ea   :  { %3698 = vmatprep.subr.mxu0 %v4164_v47 }
 0x5eb   :  { %3699 = vmatpush3.msra.mxu0 %v2924_v41 }
 0x5ec   :  { %3700 = vmatprep.subr.mxu0 %v4164_v47 }
 0x5ed   :  { %3701 = vmatpush3.msra.mxu0 %v2923_v54 }
 0x5ee   :  { %3702 = vmatprep.subr.mxu0 %v4164_v47 }
 0x5ef   :  { %3703 = vmatpush3.msra.mxu0 %v2922_v43 }
 0x5f0   :  { %3704 = vmatprep.subr.mxu0 %v4164_v47 }
 0x5f1   :  { %3705 = vmatpush3.msra.mxu0 %v2921_v44 }
 0x5f2   :  { %3706 = vmatprep.subr.mxu0 %v4164_v47 }
 0x5f3   :  { %3707 = vmatpush3.msra.mxu0 %v2920_v45 }
 0x5f4   :  { %3708 = vmatprep.subr.mxu0 %v4164_v47 }
 0x5f5   :  { %3709 = vmatpush3.msra.mxu0 %v2919_v46  ;;  %v2200_v46 = vld [vmem:[%s5007_s14] sm:$0xff] }
 0x5f6   :  { %3710 = vmatprep.subr.mxu0 %v4164_v47 }
 0x5f7   :  { %3711 = vmatpush3.msra.mxu0 %v2918_v48  ;;  %v2471_v48 = vld [vmem:[%s5008_s15 + $0x78] sm:$0xff] }
 0x5f8   :  { %3712 = vmatprep.subr.mxu0 %v4164_v47 }
 0x5f9   :  { %3713 = vmatpush3.msra.mxu0 %v2917_v49  ;;  %v2469_v49 = vld [vmem:[%s5008_s15 + $0x68] sm:$0xff] }
 0x5fa   :  { %3714 = vmatprep.subr.mxu0 %v4164_v47 }
 0x5fb   :  { %3715 = vmatpush3.msra.mxu0 %v2916_v51  ;;  %v2468_v51 = vld [vmem:[%s5008_s15 + $0x60] sm:$0xff] }
 0x5fc   :  { %3716 = vmatprep.subr.mxu0 %v4164_v47 }
 0x5fd   :  { %3717 = vmatpush3.msra.mxu0 %v2915_v53  ;;  %v2467_v53 = vld [vmem:[%s5008_s15 + $0x58] sm:$0xff] }
 0x5fe   :  { %3718 = vmatprep.subr.mxu0 %v4164_v47 }
 0x5ff   :  { %3719 = vmatpush3.msra.mxu0 %v2914_v55  ;;  %v2466_v55 = vld [vmem:[%s5008_s15 + $0x50] sm:$0xff] }
 0x600   :  { %3720 = vmatprep.subr.mxu0 %v4164_v47 }
 0x601   :  { %3721 = vmatpush3.msra.mxu0 %v2913_v56  ;;  %v2465_v56 = vld [vmem:[%s5008_s15 + $0x48] sm:$0xff] }
 0x602   :  { %3722 = vmatprep.subr.mxu0 %v4164_v47 }
 0x603   :  { %3723 = vmatpush3.msra.mxu0 %v2912_v57  ;;  %v2463_v57 = vld [vmem:[%s5008_s15 + $0x38] sm:$0xff] }
 0x604   :  { %3724 = vmatprep.subr.mxu0 %v4164_v47 }
 0x605   :  { %3725 = vmatpush3.msra.mxu0 %v2911_v58  ;;  %v2462_v58 = vld [vmem:[%s5008_s15 + $0x30] sm:$0xff] }
 0x606   :  { %3764 = vmatprep.subr.mxu0 %v4164_v47 }
 0x6a2   :  { %v1785_v59 = vpop.f32.mrf.mxu0 }
 0x6a3   :  { %3762 = vmatmul.mubr.f32.vlgmr.msra.gmra.mxu1 %v1785_v59  ;;  %v2461_v59 = vld [vmem:[%s5008_s15 + $0x28] sm:$0xff] }
 0x6a4   :  { %v3688_v60 = vpop.f32.mrf.mxu0  ;;  %3836 = vmatprep.mubr.msk.f32.mxu1 %vm4165_vm1, %v4164_v47  ;;  %3805 = vmatpush3.msra.mxu1 %v2217_v19  ;;  %v2961_v19 = vld [vmem:[%s5008_s15 + $0xd0] sm:$0xff] }
 0x6a5   :  { %3806 = vmatprep.subr.mxu1 %v4164_v47  ;;  %v2460_v60 = vld [vmem:[%s5008_s15 + $0x20] sm:$0xff] }
 0x6a6   :  { %v1871_v42 = vpop.f32.mrf.mxu0  ;;  %3807 = vmatpush3.msra.mxu1 %v2216_v20  ;;  %v2960_v20 = vld [vmem:[%s5008_s15 + $0xc8] sm:$0xff] }
 0x6a7   :  { %3727 = vmatmul.mubr.f32.vlgmr.msra.gmra.mxu0 %v1871_v42  ;;  %3808 = vmatprep.subr.mxu1 %v4164_v47  ;;  %v2459_v42 = vld [vmem:[%s5008_s15 + $0x18] sm:$0xff] }
 0x6a8   :  { %3765 = vmatpush3.msra.mxu0 %v4547_v38  ;;  %v3693_v61 = vpop.f32.mrf.mxu0  ;;  %3766 = vmatprep.mubr.msk.f32.mxu0 %vm4165_vm1, %v4164_v47  ;;  %v2202_v38 = vld [vmem:[#allocation13] sm:$0xff] }
 0x6a9   :  { %3769 = vmatprep.subr.mxu0 %v4164_v47  ;;  %3809 = vmatpush3.msra.mxu1 %v2215_v21  ;;  %v2904_v61 = vld [vmem:[#allocation7] ss:$0 sm:$0xff] }
 0x6aa   :  { %3810 = vmatprep.subr.mxu1 %v4164_v47  ;;  %v2959_v21 = vld [vmem:[%s5008_s15 + $0xc0] sm:$0xff] }
 0x6ab   :  { %3767 = vmatmul.mubr.msk.f32.vlgmr.msra.gmra.mxu0 %vm1225_vm2, %v4432_v5  ;;  %v2940_v5 = vld [vmem:[%s5002_s9 + $0x160] sm:$0xff]  ;;  %3811 = vmatpush3.msra.mxu1 %v2214_v22  ;;  %v2958_v22 = vld [vmem:[%s5008_s15 + $0xb8] sm:$0xff] }
 0x6ac   :  { %3770 = vmatpush3.msra.mxu0 %v2943_v62  ;;  %3801 = vmatprep.mubr.msk.f32.mxu0 %vm4165_vm1, %v4164_v47  ;;  %v1219_v62 = vadd.f32 %v2904_v61, %v4477_v13 }
 0x6ad   :  { %3771 = vmatprep.subr.mxu0 %v4164_v47  ;;  %3812 = vmatprep.subr.mxu1 %v4164_v47 }
 0x6ae   :  { %3772 = vmatpush3.msra.mxu0 %v2942_v63  ;;  %3813 = vmatpush3.msra.mxu1 %v2213_v23  ;;  %v1218_v63 = vadd.f32 %v2904_v61, %v4480_v16  ;;  %v2957_v23 = vld [vmem:[%s5008_s15 + $0xb0] sm:$0xff]  ;;  %v2970_v61 = vld [vmem:[%s5008_s15 + $0x108] sm:$0xff] }
 0x6af   :  { %3773 = vmatprep.subr.mxu0 %v4164_v47  ;;  %3814 = vmatprep.subr.mxu1 %v4164_v47 }
 0x6b0   :  { %3774 = vmatpush3.msra.mxu0 %v2941_v0  ;;  %3815 = vmatpush3.msra.mxu1 %v2212_v24  ;;  %v3982_v0 = vld [vmem:[%s5020_s7 + $0x8] sm:$0xff] }
 0x6b1   :  { %3775 = vmatprep.subr.mxu0 %v4164_v47  ;;  %3816 = vmatprep.subr.mxu1 %v4164_v47  ;;  %v2956_v24 = vld [vmem:[%s5008_s15 + $0xa8] sm:$0xff] }
 0x6b2   :  { %3776 = vmatpush3.msra.mxu0 %v2940_v5  ;;  %3817 = vmatpush3.msra.mxu1 %v2211_v25  ;;  %v1221_v5 = vadd.f32 %v3982_v0, %v1219_v62  ;;  %v2955_v25 = vld [vmem:[%s5008_s15 + $0xa0] sm:$0xff] }
 0x6b3   :  { %3777 = vmatprep.subr.mxu0 %v4164_v47  ;;  %3818 = vmatprep.subr.mxu1 %v4164_v47  ;;  %v2969_v62 = vld [vmem:[%s5008_s15 + $0x100] sm:$0xff] }
 0x6b4   :  { %3778 = vmatpush3.msra.mxu0 %v2939_v1  ;;  %3819 = vmatpush3.msra.mxu1 %v2210_v26  ;;  %v3983_v1 = vld [vmem:[%s5020_s7] sm:$0xff]  ;;  %v2458_v26 = vld [vmem:[%s5008_s15 + $0x10] sm:$0xff] }
 0x6b5   :  { %3779 = vmatprep.subr.mxu0 %v4164_v47  ;;  %3820 = vmatprep.subr.mxu1 %v4164_v47 }
 0x6b6   :  { %3780 = vmatpush3.msra.mxu0 %v2938_v4  ;;  %3821 = vmatpush3.msra.mxu1 %v2209_v27  ;;  %v1220_v4 = vadd.f32 %v3983_v1, %v1218_v63  ;;  %v2954_v27 = vld [vmem:[%s5008_s15 + $0x98] sm:$0xff] }
 0x6b7   :  { %3781 = vmatprep.subr.mxu0 %v4164_v47  ;;  %3822 = vmatprep.subr.mxu1 %v4164_v47 }
 0x6b8   :  { %3782 = vmatpush3.msra.mxu0 %v2937_v6  ;;  %3823 = vmatpush3.msra.mxu1 %v2208_v28  ;;  %v4800_v16 = vmax.f32 %v1220_v4, 0.0  ;;  %v2457_v28 = vld [vmem:[%s5008_s15 + $0x8] sm:$0xff] }
 0x6b9   :  { %3783 = vmatprep.subr.mxu0 %v4164_v47  ;;  %3824 = vmatprep.subr.mxu1 %v4164_v47 }
 0x6ba   :  { %3784 = vmatpush3.msra.mxu0 %v2936_v8  ;;  %3825 = vmatpush3.msra.mxu1 %v2207_v29  ;;  %v2201_v8 = vld [vmem:[%s5007_s14 + $0x8] sm:$0xff]  ;;  %v2953_v29 = vld [vmem:[%s5008_s15 + $0x90] sm:$0xff] }
 0x6bb   :  { %3785 = vmatprep.subr.mxu0 %v4164_v47  ;;  %3826 = vmatprep.subr.mxu1 %v4164_v47 }
 0x6bc   :  { %3786 = vmatpush3.msra.mxu0 %v2935_v9  ;;  %3827 = vmatpush3.msra.mxu1 %v2206_v35  ;;  %v4796_v9 = vmax.f32 %v1221_v5, 0.0 }
 0x6bd   :  { %3787 = vmatprep.subr.mxu0 %v4164_v47  ;;  %3828 = vmatprep.subr.mxu1 %v4164_v47 }
 0x6be   :  { %3788 = vmatpush3.msra.mxu0 %v2934_v10  ;;  %3829 = vmatpush3.msra.mxu1 %v2205_v36  ;;  %v2382_v10 = vld [vmem:[%s5010_s17] sm:$0xff] }
 0x6bf   :  { %3789 = vmatprep.subr.mxu0 %v4164_v47  ;;  %3830 = vmatprep.subr.mxu1 %v4164_v47 }
 0x6c0   :  { %3790 = vmatpush3.msra.mxu0 %v2933_v11  ;;  %3831 = vmatpush3.msra.mxu1 %v2204_v37  ;;  %v2949_v11 = vld [vmem:[%s5010_s17 + $0x8] sm:$0xff] }
 0x6c1   :  { %3791 = vmatprep.subr.mxu0 %v4164_v47  ;;  %3832 = vmatprep.subr.mxu1 %v4164_v47 }
 0x6c2   :  { %3792 = vmatpush3.msra.mxu0 %v2932_v12  ;;  %3833 = vmatpush3.msra.mxu1 %v2203_v7  ;;  %v2966_v12 = vld [vmem:[%s5008_s15 + $0xf8] sm:$0xff] }
 0x6c3   :  { %3793 = vmatprep.subr.mxu0 %v4164_v47  ;;  %3834 = vmatprep.subr.mxu1 %v4164_v47 }
 0x6c4   :  { %3794 = vmatpush3.msra.mxu0 %v2931_v14  ;;  %3835 = vmatpush3.msra.mxu1 %v2202_v38  ;;  %v2965_v14 = vld [vmem:[%s5008_s15 + $0xf0] sm:$0xff] }
 0x6c5   :  { %3795 = vmatprep.subr.mxu0 %v4164_v47  ;;  %3893 = vmatprep.subr.mxu1 %v4164_v47 }
 0x6c6   :  { %3796 = vmatpush3.msra.mxu0 %v2930_v15  ;;  %v2964_v15 = vld [vmem:[%s5008_s15 + $0xe8] sm:$0xff] }
 0x6c7   :  { %3797 = vmatprep.subr.mxu0 %v4164_v47 }
 0x6c8   :  { %3798 = vmatpush3.msra.mxu0 %v2929_v17  ;;  %v2963_v17 = vld [vmem:[%s5008_s15 + $0xe0] sm:$0xff] }
 0x6c9   :  { %3799 = vmatprep.subr.mxu0 %v4164_v47 }
 0x6ca   :  { %3800 = vmatpush3.msra.mxu0 %v2928_v18  ;;  %v2962_v18 = vld [vmem:[%s5008_s15 + $0xd8] sm:$0xff] }
 0x763   :  { %v2028_v2 = vpop.f32.mrf.mxu1 }
 0x765   :  { %v3763_v30 = vpop.f32.mrf.mxu1 }
 0x766   :  { %v2952_v30 = vld [vmem:[%s5008_s15 + $0x88] sm:$0xff] }
 0x767   :  { %v1958_v31 = vpop.f32.mrf.mxu0 }
 0x768   :  { %v2029_v32 = vadd.f32 %v2028_v2, %v1958_v31  ;;  %v2456_v2 = vld [vmem:[%s5008_s15] sm:$0xff] }
 0x769   :  { %v3728_v33 = vpop.f32.mrf.mxu0  ;;  %v2951_v31 = vld [vmem:[%s5008_s15 + $0x80] sm:$0xff] }
 0x76b   :  { %v2098_v34 = vpop.f32.mrf.mxu0 }
 0x76c   :  { %3802 = vmatmul.mubr.f32.vlgmr.msra.gmra.mxu0 %v2098_v34 }
 0x76d   :  { %v3768_v3 = vpop.f32.mrf.mxu0  ;;  %3841 = vmatprep.mubr.msk.f32.mxu0 %vm1225_vm2, %v2200_v46  ;;  %v2984_v46 = vld [vmem:[%s5008_s15 + $0x178] sm:$0xff] }
 0x82c   :  { %v2185_v39 = vpop.f32.mrf.mxu0 }
 0x82d   :  { %v2189_v41 = vadd.f32 %v2185_v39, %v2029_v32  ;;  %v2945_v32 = vld [vmem:[%s5006_s13] ss:$0 sm:$0xff] }
 0x82e   :  { %v3803_v54 = vpop.f32.mrf.mxu0 }
 0x82f   :  { %v2197_v43 = vadd.f32 %v2944_v52, %v2189_v41 }
 0x831   :  { %v4722_v44 = vadd.f32 %v2197_v43, %v4379_v50  ;;  %v2470_v50 = vld [vmem:[%s5008_s15 + $0x70] sm:$0xff] }
 0x832   :  { %v2967_v43 = vld [vmem:[%s5010_s17 + $0x10] sm:$0xff] }
 0x833   :  { %v2199_v45 = vmax.f32 %v4722_v44, 0.0 }
 0x835   :  { %3837 = vmatmul.mubr.f32.vlgmr.msra.gmra.mxu1 %v2199_v45 }
 0x836   :  { %3925 = vmatprep.mubr.msk.f32.mxu1 %vm4165_vm1, %v4164_v47  ;;  %3894 = vmatpush3.msra.mxu1 %v2471_v48  ;;  %v2983_v48 = vld [vmem:[%s5008_s15 + $0x170] sm:$0xff] }
 0x837   :  { %3895 = vmatprep.subr.mxu1 %v4164_v47 }
 0x838   :  { %3896 = vmatpush3.msra.mxu1 %v2470_v50  ;;  %v2982_v50 = vld [vmem:[%s5008_s15 + $0x168] sm:$0xff] }
 0x839   :  { %3897 = vmatprep.subr.mxu1 %v4164_v47 }
 0x83a   :  { %3898 = vmatpush3.msra.mxu1 %v2469_v49  ;;  %v2981_v49 = vld [vmem:[%s5008_s15 + $0x160] sm:$0xff] }
 0x83b   :  { %3899 = vmatprep.subr.mxu1 %v4164_v47 }
 0x83c   :  { %3900 = vmatpush3.msra.mxu1 %v2468_v51  ;;  %v2980_v51 = vld [vmem:[%s5008_s15 + $0x158] sm:$0xff] }
 0x83d   :  { %3901 = vmatprep.subr.mxu1 %v4164_v47 }
 0x83e   :  { %3902 = vmatpush3.msra.mxu1 %v2467_v53  ;;  %v2979_v53 = vld [vmem:[%s5008_s15 + $0x150] sm:$0xff] }
 0x83f   :  { %3903 = vmatprep.subr.mxu1 %v4164_v47 }
 0x840   :  { %3904 = vmatpush3.msra.mxu1 %v2466_v55  ;;  %v2978_v55 = vld [vmem:[%s5008_s15 + $0x148] sm:$0xff] }
 0x841   :  { %3905 = vmatprep.subr.mxu1 %v4164_v47 }
 0x842   :  { %3906 = vmatpush3.msra.mxu1 %v2465_v56  ;;  %v2977_v56 = vld [vmem:[%s5008_s15 + $0x140] sm:$0xff] }
 0x843   :  { %3907 = vmatprep.subr.mxu1 %v4164_v47 }
 0x844   :  { %3908 = vmatpush3.msra.mxu1 %v2464_v40  ;;  %v2976_v40 = vld [vmem:[%s5008_s15 + $0x138] sm:$0xff] }
 0x845   :  { %3909 = vmatprep.subr.mxu1 %v4164_v47 }
 0x846   :  { %3910 = vmatpush3.msra.mxu1 %v2463_v57  ;;  %v2975_v57 = vld [vmem:[%s5008_s15 + $0x130] sm:$0xff] }
 0x847   :  { %3911 = vmatprep.subr.mxu1 %v4164_v47 }
 0x848   :  { %3912 = vmatpush3.msra.mxu1 %v2462_v58  ;;  %v2974_v58 = vld [vmem:[%s5008_s15 + $0x128] sm:$0xff] }
 0x849   :  { %3913 = vmatprep.subr.mxu1 %v4164_v47 }
 0x84a   :  { %3914 = vmatpush3.msra.mxu1 %v2461_v59  ;;  %v2973_v59 = vld [vmem:[%s5008_s15 + $0x120] sm:$0xff] }
 0x84b   :  { %3915 = vmatprep.subr.mxu1 %v4164_v47 }
 0x84c   :  { %3916 = vmatpush3.msra.mxu1 %v2460_v60  ;;  %v2972_v60 = vld [vmem:[%s5008_s15 + $0x118] sm:$0xff] }
 0x84d   :  { %3917 = vmatprep.subr.mxu1 %v4164_v47 }
 0x84e   :  { %3918 = vmatpush3.msra.mxu1 %v2459_v42  ;;  %v2971_v42 = vld [vmem:[%s5008_s15 + $0x110] sm:$0xff] }
 0x84f   :  { %3919 = vmatprep.subr.mxu1 %v4164_v47 }
 0x850   :  { %3920 = vmatpush3.msra.mxu1 %v2458_v26 }
 0x851   :  { %3921 = vmatprep.subr.mxu1 %v4164_v47 }
 0x852   :  { %3922 = vmatpush3.msra.mxu1 %v2457_v28 }
 0x853   :  { %3923 = vmatprep.subr.mxu1 %v4164_v47 }
 0x854   :  { %3924 = vmatpush3.msra.mxu1 %v2456_v2 }
 0x8f5   :  { %v2284_v6 = vpop.f32.mrf.mxu1 }
 0x8f6   :  { %3839 = vmatprep.subr.mxu0 %v2284_v6 }
 0x8f7   :  { %v3838_v13 = vpop.f32.mrf.mxu1  ;;  %3840 = vmatpush3.msra.mxu0 %v2284_v6 }
 0x8f8   :  { %3842 = vmatmul.mubr.msk.f32.vlgmr.msra.gmra.mxu0 %vm1225_vm2, %v2201_v8  ;;  %3844 = vmatprep.subr.mxu0 %v4164_v47  ;;  %v2985_v13 = vld [vmem:[%s5009_s16] ss:$0 sm:$0xff] }
 0x8f9   :  { %3845 = vmatpush3.msra.mxu0 %v4796_v9  ;;  %3848 = vmatprep.mubr.msk.f32.mxu0 %vm4165_vm1, %v4164_v47 }
 0x8fa   :  { %3846 = vmatprep.subr.mxu0 %v4164_v47 }
 0x8fb   :  { %3847 = vmatpush3.msra.mxu0 %v4800_v16 }
 0x8fc   :  { %3849 = vmatmul.mubr.msk.f32.vlgmr.msra.gmra.mxu0 %vm171_vm0, %v2382_v10  ;;  %3851 = vmatprep.subr.mxu0 %v4164_v47 }
 0x8fd   :  { %3852 = vmatpush3.msra.mxu0 %v4796_v9  ;;  %3855 = vmatprep.mubr.msk.f32.mxu0 %vm4165_vm1, %v4164_v47 }
 0x8fe   :  { %3853 = vmatprep.subr.mxu0 %v4164_v47 }
 0x8ff   :  { %3854 = vmatpush3.msra.mxu0 %v4800_v16 }
 0x900   :  { %3856 = vmatmul.mubr.msk.f32.vlgmr.msra.gmra.mxu0 %vm171_vm0, %v2949_v11  ;;  %3858 = vmatprep.subr.mxu0 %v4164_v47 }
 0x901   :  { %3859 = vmatpush3.msra.mxu0 %v2966_v12  ;;  %3890 = vmatprep.mubr.msk.f32.mxu0 %vm4165_vm1, %v4164_v47 }
 0x902   :  { %3860 = vmatprep.subr.mxu0 %v4164_v47 }
 0x903   :  { %3861 = vmatpush3.msra.mxu0 %v2965_v14 }
 0x904   :  { %3862 = vmatprep.subr.mxu0 %v4164_v47 }
 0x905   :  { %3863 = vmatpush3.msra.mxu0 %v2964_v15 }
 0x906   :  { %3864 = vmatprep.subr.mxu0 %v4164_v47 }
 0x907   :  { %3865 = vmatpush3.msra.mxu0 %v2963_v17 }
 0x908   :  { %3866 = vmatprep.subr.mxu0 %v4164_v47 }
 0x909   :  { %3867 = vmatpush3.msra.mxu0 %v2962_v18 }
 0x90a   :  { %3868 = vmatprep.subr.mxu0 %v4164_v47 }
 0x90b   :  { %3869 = vmatpush3.msra.mxu0 %v2961_v19 }
 0x90c   :  { %3870 = vmatprep.subr.mxu0 %v4164_v47 }
 0x90d   :  { %3871 = vmatpush3.msra.mxu0 %v2960_v20 }
 0x90e   :  { %3872 = vmatprep.subr.mxu0 %v4164_v47 }
 0x90f   :  { %3873 = vmatpush3.msra.mxu0 %v2959_v21 }
 0x910   :  { %3874 = vmatprep.subr.mxu0 %v4164_v47 }
 0x911   :  { %3875 = vmatpush3.msra.mxu0 %v2958_v22 }
 0x912   :  { %3876 = vmatprep.subr.mxu0 %v4164_v47 }
 0x913   :  { %3877 = vmatpush3.msra.mxu0 %v2957_v23 }
 0x914   :  { %3878 = vmatprep.subr.mxu0 %v4164_v47 }
 0x915   :  { %3879 = vmatpush3.msra.mxu0 %v2956_v24 }
 0x916   :  { %3880 = vmatprep.subr.mxu0 %v4164_v47 }
 0x917   :  { %3881 = vmatpush3.msra.mxu0 %v2955_v25 }
 0x918   :  { %3882 = vmatprep.subr.mxu0 %v4164_v47 }
 0x919   :  { %3883 = vmatpush3.msra.mxu0 %v2954_v27 }
 0x91a   :  { %3884 = vmatprep.subr.mxu0 %v4164_v47 }
 0x91b   :  { %3885 = vmatpush3.msra.mxu0 %v2953_v29 }
 0x91c   :  { %3886 = vmatprep.subr.mxu0 %v4164_v47 }
 0x91d   :  { %3887 = vmatpush3.msra.mxu0 %v2952_v30 }
 0x91e   :  { %3888 = vmatprep.subr.mxu0 %v4164_v47 }
 0x91f   :  { %3889 = vmatpush3.msra.mxu0 %v2951_v31 }
 0x920   :  { %3928 = vmatprep.subr.mxu0 %v4164_v47 }
 0x9b8   :  { %v3843_v33 = vpop.f32.mrf.mxu0 }
 0x9b9   :  { %v2373_v34 = vadd.f32 %v3843_v33, %v2945_v32 }
 0x9ba   :  { %v2367_v3 = vpop.f32.mrf.mxu0 }
 0x9bb   :  { %v2377_v35 = vadd.f32 %v2373_v34, %v4796_v9  ;;  %v2368_v36 = vadd.f32 %v2945_v32, %v2367_v3 }
 0x9bc   :  { %v2452_v37 = vpop.f32.mrf.mxu0 }
 0x9bd   :  { %v2379_v7 = vmax.f32 %v2377_v35, 0.0  ;;  %v2376_v38 = vadd.f32 %v2368_v36, %v4800_v16  ;;  %3926 = vmatmul.mubr.f32.vlgmr.msra.gmra.mxu1 %v2452_v37 }
 0x9be   :  { %v3850_v39 = vpop.f32.mrf.mxu0 }
 0x9bf   :  { %2381 = vst [vmem:[%s5011_s18 + $0x8] sm:$0xff] %v2379_v7  ;;  %v2378_v52 = vmax.f32 %v2376_v38, 0.0 }
 0x9c0   :  { %v2543_v41 = vpop.f32.mrf.mxu0 }
 0x9c1   :  { %2380 = vst [vmem:[%s5011_s18] sm:$0xff] %v2378_v52  ;;  %3891 = vmatmul.mubr.f32.vlgmr.msra.gmra.mxu0 %v2543_v41 }
 0x9c2   :  { %3929 = vmatpush3.msra.mxu0 %v4796_v9  ;;  %v3857_v54 = vpop.f32.mrf.mxu0  ;;  %3932 = vmatprep.mubr.msk.f32.mxu0 %vm4165_vm1, %v4164_v47 }
 0x9c3   :  { %3930 = vmatprep.subr.mxu0 %v4164_v47 }
 0x9c4   :  { %3931 = vmatpush3.msra.mxu0 %v4800_v16 }
 0x9c5   :  { %3933 = vmatmul.mubr.msk.f32.vlgmr.msra.gmra.mxu0 %vm171_vm0, %v2967_v43  ;;  %3935 = vmatprep.subr.mxu0 %v4164_v47 }
 0x9c6   :  { %3936 = vmatpush3.msra.mxu0 %v2984_v46  ;;  %3967 = vmatprep.mubr.msk.f32.mxu0 %vm4165_vm1, %v4164_v47 }
 0x9c7   :  { %3937 = vmatprep.subr.mxu0 %v4164_v47 }
 0x9c8   :  { %3938 = vmatpush3.msra.mxu0 %v2983_v48 }
 0x9c9   :  { %3939 = vmatprep.subr.mxu0 %v4164_v47 }
 0x9ca   :  { %3940 = vmatpush3.msra.mxu0 %v2982_v50 }
 0x9cb   :  { %3941 = vmatprep.subr.mxu0 %v4164_v47 }
 0x9cc   :  { %3942 = vmatpush3.msra.mxu0 %v2981_v49 }
 0x9cd   :  { %3943 = vmatprep.subr.mxu0 %v4164_v47 }
 0x9ce   :  { %3944 = vmatpush3.msra.mxu0 %v2980_v51 }
 0x9cf   :  { %3945 = vmatprep.subr.mxu0 %v4164_v47 }
 0x9d0   :  { %3946 = vmatpush3.msra.mxu0 %v2979_v53 }
 0x9d1   :  { %3947 = vmatprep.subr.mxu0 %v4164_v47 }
 0x9d2   :  { %3948 = vmatpush3.msra.mxu0 %v2978_v55 }
 0x9d3   :  { %3949 = vmatprep.subr.mxu0 %v4164_v47 }
 0x9d4   :  { %3950 = vmatpush3.msra.mxu0 %v2977_v56 }
 0x9d5   :  { %3951 = vmatprep.subr.mxu0 %v4164_v47 }
 0x9d6   :  { %3952 = vmatpush3.msra.mxu0 %v2976_v40 }
 0x9d7   :  { %3953 = vmatprep.subr.mxu0 %v4164_v47 }
 0x9d8   :  { %3954 = vmatpush3.msra.mxu0 %v2975_v57 }
 0x9d9   :  { %3955 = vmatprep.subr.mxu0 %v4164_v47 }
 0x9da   :  { %3956 = vmatpush3.msra.mxu0 %v2974_v58 }
 0x9db   :  { %3957 = vmatprep.subr.mxu0 %v4164_v47 }
 0x9dc   :  { %3958 = vmatpush3.msra.mxu0 %v2973_v59 }
 0x9dd   :  { %3959 = vmatprep.subr.mxu0 %v4164_v47 }
 0x9de   :  { %3960 = vmatpush3.msra.mxu0 %v2972_v60 }
 0x9df   :  { %3961 = vmatprep.subr.mxu0 %v4164_v47 }
 0x9e0   :  { %3962 = vmatpush3.msra.mxu0 %v2971_v42 }
 0x9e1   :  { %3963 = vmatprep.subr.mxu0 %v4164_v47 }
 0x9e2   :  { %3964 = vmatpush3.msra.mxu0 %v2970_v61 }
 0x9e3   :  { %3965 = vmatprep.subr.mxu0 %v4164_v47 }
 0x9e4   :  { %3966 = vmatpush3.msra.mxu0 %v2969_v62 }
 0xa7d   :  { %v2700_v63 = vpop.f32.mrf.mxu1 }
 0xa7f   :  { %v3927_v0 = vpop.f32.mrf.mxu1 }
 0xa81   :  { %v2630_v5 = vpop.f32.mrf.mxu0 }
 0xa82   :  { %v2701_v1 = vadd.f32 %v2700_v63, %v2630_v5 }
 0xa83   :  { %v3892_v4 = vpop.f32.mrf.mxu0 }
 0xa85   :  { %v2775_v6 = vpop.f32.mrf.mxu0 }
 0xa86   :  { %3968 = vmatmul.mubr.f32.vlgmr.msra.gmra.mxu0 %v2775_v6 }
 0xa87   :  { %v3934_v8 = vpop.f32.mrf.mxu0 }
 0xb46   :  { %v2862_v9 = vpop.f32.mrf.mxu0 }
 0xb47   :  { %v2866_v16 = vadd.f32 %v2862_v9, %v2701_v1 }
 0xb48   :  { %v3969_v47 = vpop.f32.mrf.mxu0 }
 0xb49   :  { %v2874_v10 = vadd.f32 %v2985_v13, %v2866_v16 }
 0xb4b   :  { %v2875_v11 = vadd.f32 %v2874_v10, %v2199_v45 }
 0xb4d   :  { %v2876_v12 = vmax.f32 %v2875_v11, 0.0 }
 0xb4f   :  { %2877 = vst [vmem:[%s5012_s19] sm:$0xff] %v2876_v12 }
 0xb50   :  { %2886 = vsyncpa [#allocation3], 1 }
 0xb51   :  { %2887 = vsyncpa [#allocation5], 1 }
 0xb52   :  { %2888 = vsyncpa [#allocation8], 1 }
 0xb53   :  { %2889 = vsyncpa [#allocation11], 1 }
 0xb54   :  { %2890 = vsyncpa [#allocation14], 1 }

</bundles_post_ra>
